<compile_context>
chip_gen: v7x
topology: tpu7x:2x2x1
jax: 0.10.0
libtpu: 0.0.40
codegen_flags: <defaults>
</compile_context>

<pallas_src>
import functools
import math

import jax
import jax.numpy as jnp
from jax.experimental import pallas as pl
from jax.experimental.pallas import tpu as pltpu


# ---------------------------------------------------------------------------
# In-kernel helpers
# ---------------------------------------------------------------------------
_INV_SQRT2 = 0.7071067811865476


def _erf_approx(x):
    # Abramowitz & Stegun 7.1.26, |err| <= 1.5e-7 (only exp / mul / add / div).
    a1, a2, a3, a4, a5 = (0.254829592, -0.284496736, 1.421413741,
                          -1.453152027, 1.061405429)
    t = 1.0 / (1.0 + 0.3275911 * jnp.abs(x))
    poly = t * (a1 + t * (a2 + t * (a3 + t * (a4 + t * a5))))
    y = 1.0 - poly * jnp.exp(-(x * x))
    return jnp.where(x >= 0, y, -y)


def _gelu_exact(x):
    # torch.nn.GELU() default (approximate='none'): x * Phi(x).
    return 0.5 * x * (1.0 + _erf_approx(x * _INV_SQRT2))


# ---------------------------------------------------------------------------
# Fused Pallas kernel: the entire Net_coor forward.
#   conv1 weights are passed separately (different d_in); the remaining
#   (convs + convl) layers are stacked along a leading axis with convl's
#   output dimension zero-padded to d_graph_layer.
#   Packed projection columns: [ Q*scale | K | V | skip | (Q*scale)@We^T ].
# ---------------------------------------------------------------------------
def _net_coor_kernel(x_ref, ed_ref, mask_ref,
                     w1_ref, b1_ref, we1_ref,
                     wr_ref, br_ref, wer_ref,
                     o_ref, *, n_rest, edge_dim, d_model, residue):
    m = mask_ref[...]                                          # [N, N] f32
    neg_bias = jnp.where(m > 0, jnp.float32(0.0), jnp.float32(-1e30))
    d = d_model

    def tconv(x, w, b, we):
        # One packed 4*D+edge_dim wide MXU matmul per layer.
        proj = jnp.dot(x, w, preferred_element_type=jnp.float32) + b
        q = proj[:, 0 * d:1 * d]          # already scaled by 1/sqrt(d_out)
        k = proj[:, 1 * d:2 * d]
        v = proj[:, 2 * d:3 * d]
        skip = proj[:, 3 * d:4 * d]
        qwe = proj[:, 4 * d:4 * d + edge_dim]   # == (q_scaled @ We^T), [N, edge_dim]

        qk = jax.lax.dot_general(q, k, (((1,), (1,)), ((), ())),
                                 preferred_element_type=jnp.float32)  # [N, N]

        # qe[i,j] = sum_d ed[d,i,j] * qwe[i,d]  (edge planes sliced per use).
        qe = ed_ref[0] * qwe[:, 0:1]
        for dd in range(1, edge_dim):
            qe = qe + ed_ref[dd] * qwe[:, dd:dd + 1]                   # [N, N]

        scores = qk + qe + neg_bias            # scale already folded into q
        pexp = jnp.exp(scores - jnp.max(scores, axis=-1, keepdims=True)) * m
        denom = jnp.maximum(jnp.sum(pexp, axis=-1, keepdims=True),
                            jnp.float32(1e-20))
        # EUP reciprocal on the [N,1] denominator + one Newton step (full f32
        # accuracy), then a single [N,N] multiply instead of N^2 divides.
        inv = pl.reciprocal(denom, approx=True)
        inv = inv * (2.0 - denom * inv)
        alpha = pexp * inv
        # NOTE: fully-masked rows fall back to out = skip_i via the 1e-20
        # denominator guard (alpha = 0), matching the reference.

        # out_i = sum_j alpha_ij * (v_j + e_ij) + skip_i
        out = jnp.dot(alpha, v, preferred_element_type=jnp.float32) + skip
        # Edge message via one tiny MXU matmul: s[i,dd] = sum_j alpha_ij*ed[dd,i,j]
        s = jnp.concatenate(
            [jnp.sum(alpha * ed_ref[dd], axis=-1, keepdims=True)
             for dd in range(edge_dim)], axis=1)                       # [N, edge_dim]
        out = out + jnp.dot(s, we, preferred_element_type=jnp.float32)
        return out

    # conv1 -> GELU  (Dropout = identity, eval mode)
    x = _gelu_exact(tconv(x_ref[...], w1_ref[...], b1_ref[...], we1_ref[...]))

    # convs (GELU + residual) ... convl (raw)
    for l in range(n_rest):
        h = tconv(x, wr_ref[l], br_ref[l], wer_ref[l])
        if l < n_rest - 1:
            h = _gelu_exact(h)
            x = h + x if residue else h
        else:
            x = h

    o_ref[...] = x.astype(o_ref.dtype)                         # [N, D] (padded)


# ---------------------------------------------------------------------------
# Wrapper: pack / pad / pre-scale parameters, single pallas_call, slice 3 cols.
# ---------------------------------------------------------------------------
def _pack_tconv(p, d_pad):
    d_out = p["wq"].shape[1]
    scale = 1.0 / math.sqrt(d_out)
    pad_c = ((0, 0), (0, d_pad - d_out))
    wq_s = p["wq"] * scale                                     # fold attn scale
    bq_s = p["bq"] * scale
    w_qe = wq_s @ p["we"].T                                    # [d_in, edge_dim]
    b_qe = bq_s @ p["we"].T                                    # [1, edge_dim]
    w = jnp.concatenate([jnp.pad(wq_s, pad_c), jnp.pad(p["wk"], pad_c),
                         jnp.pad(p["wv"], pad_c), jnp.pad(p["ws"], pad_c),
                         w_qe], axis=1)                        # [d_in, 4*d_pad+ed]
    b = jnp.concatenate([jnp.pad(bq_s, pad_c), jnp.pad(p["bk"], pad_c),
                         jnp.pad(p["bv"], pad_c), jnp.pad(p["bs"], pad_c),
                         b_qe], axis=1)                        # [1, 4*d_pad+ed]
    we = jnp.pad(p["we"], pad_c)                               # [edge_dim, d_pad]
    return w, b, we


def net_coor_forward(x, ed_dense, mask, params, residue=True):
    n = x.shape[0]
    d_layer = params["conv1"]["wq"].shape[1]
    d_last = params["convl"]["wq"].shape[1]
    edge_dim = params["conv1"]["we"].shape[0]

    w1, b1, we1 = _pack_tconv(params["conv1"], d_layer)
    rest = list(params["convs"]) + [params["convl"]]
    packed = [_pack_tconv(p, d_layer) for p in rest]
    wr = jnp.stack([t[0] for t in packed])                     # [L+1, D, 4D+ed]
    br = jnp.stack([t[1] for t in packed])                     # [L+1, 1, 4D+ed]
    wer = jnp.stack([t[2] for t in packed])                    # [L+1, edge_dim, D]

    kern = functools.partial(
        _net_coor_kernel,
        n_rest=len(rest), edge_dim=edge_dim, d_model=d_layer, residue=residue)

    vmem = pl.BlockSpec(memory_space=pltpu.MemorySpace.VMEM)
    out_pad = pl.pallas_call(
        kern,
        out_shape=jax.ShapeDtypeStruct((n, d_layer), jnp.float32),
        in_specs=[vmem] * 9,
        out_specs=vmem,
        compiler_params=pltpu.CompilerParams(
            vmem_limit_bytes=32 * 1024 * 1024),
    )(x, ed_dense, mask, w1, b1, we1, wr, br, wer)
    return out_pad[:, :d_last]


# ---------------------------------------------------------------------------
# Pure-JAX reference (same math, no Pallas, exact erf GELU) for correctness.
# ---------------------------------------------------------------------------
def _tconv_ref(x, ed_dense, mask, p):
    q = x @ p["wq"] + p["bq"]
    k = x @ p["wk"] + p["bk"]
    v = x @ p["wv"] + p["bv"]
    skip = x @ p["ws"] + p["bs"]
    d_out = p["wq"].shape[1]
    e = jnp.einsum("dij,dk->ijk", ed_dense, p["we"])
    scores = (q @ k.T + jnp.einsum("ik,ijk->ij", q, e)) / math.sqrt(d_out)
    neg = jnp.where(mask > 0, scores, -1e30)
    pm = jnp.exp(neg - neg.max(-1, keepdims=True)) * mask
    alpha = pm / jnp.maximum(pm.sum(-1, keepdims=True), 1e-20)
    return alpha @ v + jnp.einsum("ij,ijk->ik", alpha, e) + skip


def net_coor_ref(x, ed_dense, mask, params, residue=True):
    x = jax.nn.gelu(_tconv_ref(x, ed_dense, mask, params["conv1"]),
                    approximate=False)
    for p in params["convs"]:
        identity = x
        h = jax.nn.gelu(_tconv_ref(x, ed_dense, mask, p), approximate=False)
        x = h + identity if residue else h
    return _tconv_ref(x, ed_dense, mask, params["convl"])


# ---------------------------------------------------------------------------
# Deterministic parameter init
# ---------------------------------------------------------------------------
def _init_linear(key, d_in, d_out, bias=True):
    kw, kb = jax.random.split(key)
    scale = (2.0 / (d_in + d_out)) ** 0.5
    w = scale * jax.random.normal(kw, (d_in, d_out), jnp.float32)
    b = 0.1 * jax.random.normal(kb, (1, d_out), jnp.float32) if bias else None
    return w, b


def _init_tconv(key, d_in, d_out, edge_dim):
    ks = jax.random.split(key, 5)
    wq, bq = _init_linear(ks[0], d_in, d_out)
    wk, bk = _init_linear(ks[1], d_in, d_out)
    wv, bv = _init_linear(ks[2], d_in, d_out)
    we, _ = _init_linear(ks[3], edge_dim, d_out, bias=False)
    ws, bs = _init_linear(ks[4], d_in, d_out)
    return dict(wq=wq, bq=bq, wk=wk, bk=bk, wv=wv, bv=bv, we=we, ws=ws, bs=bs)


if __name__ == "__main__":
    # args: num_features=16, d_graph_layer=32, n_graph_layer=2, edge_dim=8,
    #       residue=True, dropout_rate (eval -> identity)
    N, NUM_FEATURES, D_LAYER, N_LAYER, EDGE_DIM = 8, 16, 32, 2, 8

    key = jax.random.PRNGKey(0)
    k_x, k_e, k_p = jax.random.split(key, 3)

    # Node features
    x = jax.random.normal(k_x, (N, NUM_FEATURES), jnp.float32)

    # Deterministic edge structure: each node i receives edges from
    # (i+1)%N, (i+2)%N, (i+5)%N  ->  E = 24, no duplicates.
    offsets = jnp.array([1, 2, 5], jnp.int32)
    tgt = jnp.repeat(jnp.arange(N, dtype=jnp.int32), offsets.shape[0])
    src = (tgt + jnp.tile(offsets, N)) % N
    edge_index = jnp.stack([src, tgt])                   # [2, E]
    E = edge_index.shape[1]
    edge_attr = jax.random.normal(k_e, (E, EDGE_DIM), jnp.float32)

    # Densify the sparse graph (glue).
    mask = jnp.zeros((N, N), jnp.float32).at[tgt, src].set(1.0)
    ed_dense = jnp.zeros((EDGE_DIM, N, N), jnp.float32).at[:, tgt, src].set(edge_attr.T)

    # Parameters: conv1 (F->D), n_graph_layer convs (D->D), convl (D->3)
    pkeys = jax.random.split(k_p, N_LAYER + 2)
    params = {
        "conv1": _init_tconv(pkeys[0], NUM_FEATURES, D_LAYER, EDGE_DIM),
        "convs": [_init_tconv(pkeys[1 + i], D_LAYER, D_LAYER, EDGE_DIM)
                  for i in range(N_LAYER)],
        "convl": _init_tconv(pkeys[-1], D_LAYER, 3, EDGE_DIM),
    }

    fwd = jax.jit(functools.partial(net_coor_forward, residue=True))
    out = fwd(x, ed_dense, mask, params)
    out = jax.block_until_ready(out)
    assert out.shape == (N, 3), out.shape

    ref = net_coor_ref(x, ed_dense, mask, params, residue=True)
    assert jnp.allclose(out, ref, atol=1e-3, rtol=1e-3), (out, ref)

    print("KERNEL_OK")
</pallas_src>

<mosaic_0001>
module attributes {stable_mosaic.version = 11 : i64} {
  func.func @_net_coor_kernel(%arg0: memref<8x16xf32, #tpu.memory_space<vmem>>, %arg1: memref<8x8x8xf32, #tpu.memory_space<vmem>>, %arg2: memref<8x8xf32, #tpu.memory_space<vmem>>, %arg3: memref<16x136xf32, #tpu.memory_space<vmem>>, %arg4: memref<1x136xf32, #tpu.memory_space<vmem>>, %arg5: memref<8x32xf32, #tpu.memory_space<vmem>>, %arg6: memref<3x32x136xf32, #tpu.memory_space<vmem>>, %arg7: memref<3x1x136xf32, #tpu.memory_space<vmem>>, %arg8: memref<3x8x32xf32, #tpu.memory_space<vmem>>, %arg9: memref<8x32xf32, #tpu.memory_space<vmem>>) attributes {dimension_semantics = [], scalar_prefetch = 0 : i64, scratch_operands = 0 : i64, tpu.core_type = #tpu.core_type<tc>} {
    %c0 = arith.constant 0 : index
    %c0_0 = arith.constant 0 : index
    %0 = vector.load %arg2[%c0, %c0_0] : memref<8x8xf32, #tpu.memory_space<vmem>>, vector<8x8xf32>
    %cst = arith.constant 0.000000e+00 : f32
    %1 = vector.broadcast %cst : f32 to vector<8x8xf32>
    %2 = arith.cmpf ogt, %0, %1 : vector<8x8xf32>
    %cst_1 = arith.constant 0.000000e+00 : f32
    %cst_2 = arith.constant -1.000000e+30 : f32
    %3 = vector.broadcast %cst_1 : f32 to vector<8x8xf32>
    %4 = vector.broadcast %cst_2 : f32 to vector<8x8xf32>
    %5 = arith.select %2, %3, %4 : vector<8x8xi1>, vector<8x8xf32>
    %c0_3 = arith.constant 0 : index
    %c0_4 = arith.constant 0 : index
    %6 = vector.load %arg0[%c0_3, %c0_4] : memref<8x16xf32, #tpu.memory_space<vmem>>, vector<8x16xf32>
    %c0_5 = arith.constant 0 : index
    %c0_6 = arith.constant 0 : index
    %7 = vector.load %arg3[%c0_5, %c0_6] : memref<16x136xf32, #tpu.memory_space<vmem>>, vector<16x136xf32>
    %c0_7 = arith.constant 0 : index
    %c0_8 = arith.constant 0 : index
    %8 = vector.load %arg4[%c0_7, %c0_8] : memref<1x136xf32, #tpu.memory_space<vmem>>, vector<1x136xf32>
    %c0_9 = arith.constant 0 : index
    %c0_10 = arith.constant 0 : index
    %9 = vector.load %arg5[%c0_9, %c0_10] : memref<8x32xf32, #tpu.memory_space<vmem>>, vector<8x32xf32>
    %cst_11 = arith.constant dense<0.000000e+00> : vector<8x136xf32>
    %10 = tpu.matmul %6, %7, %cst_11 {dimension_numbers = #tpu.dot_dimension_numbers<[1], [0], [0], [1], [0, 0, 1, 1], [], []>} : vector<8x16xf32>, vector<16x136xf32>, vector<8x136xf32> -> vector<8x136xf32>
    %11 = vector.broadcast %8 : vector<1x136xf32> to vector<8x136xf32>
    %12 = arith.addf %10, %11 : vector<8x136xf32>
    %13 = vector.extract_strided_slice %12 {offsets = [0, 0], sizes = [8, 32], strides = [1, 1]} : vector<8x136xf32> to vector<8x32xf32>
    %14 = vector.extract_strided_slice %12 {offsets = [0, 32], sizes = [8, 32], strides = [1, 1]} : vector<8x136xf32> to vector<8x32xf32>
    %15 = vector.extract_strided_slice %12 {offsets = [0, 64], sizes = [8, 32], strides = [1, 1]} : vector<8x136xf32> to vector<8x32xf32>
    %16 = vector.extract_strided_slice %12 {offsets = [0, 96], sizes = [8, 32], strides = [1, 1]} : vector<8x136xf32> to vector<8x32xf32>
    %17 = vector.extract_strided_slice %12 {offsets = [0, 128], sizes = [8, 8], strides = [1, 1]} : vector<8x136xf32> to vector<8x8xf32>
    %cst_12 = arith.constant dense<0.000000e+00> : vector<8x8xf32>
    %18 = tpu.matmul %13, %14, %cst_12 {dimension_numbers = #tpu.dot_dimension_numbers<[1], [1], [0], [0], [0, 0, 1, 0], [], []>} : vector<8x32xf32>, vector<8x32xf32>, vector<8x8xf32> -> vector<8x8xf32>
    %c0_13 = arith.constant 0 : index
    %c0_14 = arith.constant 0 : index
    %c0_15 = arith.constant 0 : index
    %19 = vector.load %arg1[%c0_13, %c0_14, %c0_15] : memref<8x8x8xf32, #tpu.memory_space<vmem>>, vector<1x8x8xf32>
    %20 = vector.shape_cast %19 : vector<1x8x8xf32> to vector<8x8xf32>
    %21 = vector.extract_strided_slice %17 {offsets = [0, 0], sizes = [8, 1], strides = [1, 1]} : vector<8x8xf32> to vector<8x1xf32>
    %22 = vector.broadcast %21 : vector<8x1xf32> to vector<8x8xf32>
    %23 = arith.mulf %20, %22 : vector<8x8xf32>
    %c1 = arith.constant 1 : index
    %c0_16 = arith.constant 0 : index
    %c0_17 = arith.constant 0 : index
    %24 = vector.load %arg1[%c1, %c0_16, %c0_17] : memref<8x8x8xf32, #tpu.memory_space<vmem>>, vector<1x8x8xf32>
    %25 = vector.shape_cast %24 : vector<1x8x8xf32> to vector<8x8xf32>
    %26 = vector.extract_strided_slice %17 {offsets = [0, 1], sizes = [8, 1], strides = [1, 1]} : vector<8x8xf32> to vector<8x1xf32>
    %27 = vector.broadcast %26 : vector<8x1xf32> to vector<8x8xf32>
    %28 = arith.mulf %25, %27 : vector<8x8xf32>
    %29 = arith.addf %23, %28 : vector<8x8xf32>
    %c2 = arith.constant 2 : index
    %c0_18 = arith.constant 0 : index
    %c0_19 = arith.constant 0 : index
    %30 = vector.load %arg1[%c2, %c0_18, %c0_19] : memref<8x8x8xf32, #tpu.memory_space<vmem>>, vector<1x8x8xf32>
    %31 = vector.shape_cast %30 : vector<1x8x8xf32> to vector<8x8xf32>
    %32 = vector.extract_strided_slice %17 {offsets = [0, 2], sizes = [8, 1], strides = [1, 1]} : vector<8x8xf32> to vector<8x1xf32>
    %33 = vector.broadcast %32 : vector<8x1xf32> to vector<8x8xf32>
    %34 = arith.mulf %31, %33 : vector<8x8xf32>
    %35 = arith.addf %29, %34 : vector<8x8xf32>
    %c3 = arith.constant 3 : index
    %c0_20 = arith.constant 0 : index
    %c0_21 = arith.constant 0 : index
    %36 = vector.load %arg1[%c3, %c0_20, %c0_21] : memref<8x8x8xf32, #tpu.memory_space<vmem>>, vector<1x8x8xf32>
    %37 = vector.shape_cast %36 : vector<1x8x8xf32> to vector<8x8xf32>
    %38 = vector.extract_strided_slice %17 {offsets = [0, 3], sizes = [8, 1], strides = [1, 1]} : vector<8x8xf32> to vector<8x1xf32>
    %39 = vector.broadcast %38 : vector<8x1xf32> to vector<8x8xf32>
    %40 = arith.mulf %37, %39 : vector<8x8xf32>
    %41 = arith.addf %35, %40 : vector<8x8xf32>
    %c4 = arith.constant 4 : index
    %c0_22 = arith.constant 0 : index
    %c0_23 = arith.constant 0 : index
    %42 = vector.load %arg1[%c4, %c0_22, %c0_23] : memref<8x8x8xf32, #tpu.memory_space<vmem>>, vector<1x8x8xf32>
    %43 = vector.shape_cast %42 : vector<1x8x8xf32> to vector<8x8xf32>
    %44 = vector.extract_strided_slice %17 {offsets = [0, 4], sizes = [8, 1], strides = [1, 1]} : vector<8x8xf32> to vector<8x1xf32>
    %45 = vector.broadcast %44 : vector<8x1xf32> to vector<8x8xf32>
    %46 = arith.mulf %43, %45 : vector<8x8xf32>
    %47 = arith.addf %41, %46 : vector<8x8xf32>
    %c5 = arith.constant 5 : index
    %c0_24 = arith.constant 0 : index
    %c0_25 = arith.constant 0 : index
    %48 = vector.load %arg1[%c5, %c0_24, %c0_25] : memref<8x8x8xf32, #tpu.memory_space<vmem>>, vector<1x8x8xf32>
    %49 = vector.shape_cast %48 : vector<1x8x8xf32> to vector<8x8xf32>
    %50 = vector.extract_strided_slice %17 {offsets = [0, 5], sizes = [8, 1], strides = [1, 1]} : vector<8x8xf32> to vector<8x1xf32>
    %51 = vector.broadcast %50 : vector<8x1xf32> to vector<8x8xf32>
    %52 = arith.mulf %49, %51 : vector<8x8xf32>
    %53 = arith.addf %47, %52 : vector<8x8xf32>
    %c6 = arith.constant 6 : index
    %c0_26 = arith.constant 0 : index
    %c0_27 = arith.constant 0 : index
    %54 = vector.load %arg1[%c6, %c0_26, %c0_27] : memref<8x8x8xf32, #tpu.memory_space<vmem>>, vector<1x8x8xf32>
    %55 = vector.shape_cast %54 : vector<1x8x8xf32> to vector<8x8xf32>
    %56 = vector.extract_strided_slice %17 {offsets = [0, 6], sizes = [8, 1], strides = [1, 1]} : vector<8x8xf32> to vector<8x1xf32>
    %57 = vector.broadcast %56 : vector<8x1xf32> to vector<8x8xf32>
    %58 = arith.mulf %55, %57 : vector<8x8xf32>
    %59 = arith.addf %53, %58 : vector<8x8xf32>
    %c7 = arith.constant 7 : index
    %c0_28 = arith.constant 0 : index
    %c0_29 = arith.constant 0 : index
    %60 = vector.load %arg1[%c7, %c0_28, %c0_29] : memref<8x8x8xf32, #tpu.memory_space<vmem>>, vector<1x8x8xf32>
    %61 = vector.shape_cast %60 : vector<1x8x8xf32> to vector<8x8xf32>
    %62 = vector.extract_strided_slice %17 {offsets = [0, 7], sizes = [8, 1], strides = [1, 1]} : vector<8x8xf32> to vector<8x1xf32>
    %63 = vector.broadcast %62 : vector<8x1xf32> to vector<8x8xf32>
    %64 = arith.mulf %61, %63 : vector<8x8xf32>
    %65 = arith.addf %59, %64 : vector<8x8xf32>
    %66 = arith.addf %18, %65 : vector<8x8xf32>
    %67 = arith.addf %66, %5 : vector<8x8xf32>
    %cst_30 = arith.constant dense<0xFF800000> : vector<8xf32>
    %68 = vector.multi_reduction <maximumf>, %67, %cst_30 [1] : vector<8x8xf32> to vector<8xf32>
    %69 = vector.shape_cast %68 : vector<8xf32> to vector<8x1xf32>
    %70 = vector.broadcast %69 : vector<8x1xf32> to vector<8x8xf32>
    %71 = arith.subf %67, %70 : vector<8x8xf32>
    %72 = math.exp %71 : vector<8x8xf32>
    %73 = arith.mulf %72, %0 : vector<8x8xf32>
    %cst_31 = arith.constant dense<0.000000e+00> : vector<8xf32>
    %74 = vector.multi_reduction <add>, %73, %cst_31 [1] : vector<8x8xf32> to vector<8xf32>
    %75 = vector.shape_cast %74 : vector<8xf32> to vector<8x1xf32>
    %cst_32 = arith.constant 9.99999968E-21 : f32
    %76 = vector.broadcast %cst_32 : f32 to vector<8x1xf32>
    %77 = arith.maximumf %75, %76 : vector<8x1xf32>
    %78 = tpu.reciprocal %77 {approx = true} : vector<8x1xf32> -> vector<8x1xf32>
    %79 = arith.mulf %77, %78 : vector<8x1xf32>
    %cst_33 = arith.constant 2.000000e+00 : f32
    %80 = vector.broadcast %cst_33 : f32 to vector<8x1xf32>
    %81 = arith.subf %80, %79 : vector<8x1xf32>
    %82 = arith.mulf %78, %81 : vector<8x1xf32>
    %83 = vector.broadcast %82 : vector<8x1xf32> to vector<8x8xf32>
    %84 = arith.mulf %73, %83 : vector<8x8xf32>
    %cst_34 = arith.constant dense<0.000000e+00> : vector<8x32xf32>
    %85 = tpu.matmul %84, %15, %cst_34 {dimension_numbers = #tpu.dot_dimension_numbers<[1], [0], [0], [1], [0, 0, 1, 1], [], []>} : vector<8x8xf32>, vector<8x32xf32>, vector<8x32xf32> -> vector<8x32xf32>
    %86 = arith.addf %85, %16 : vector<8x32xf32>
    %c0_35 = arith.constant 0 : index
    %c0_36 = arith.constant 0 : index
    %c0_37 = arith.constant 0 : index
    %87 = vector.load %arg1[%c0_35, %c0_36, %c0_37] : memref<8x8x8xf32, #tpu.memory_space<vmem>>, vector<1x8x8xf32>
    %88 = vector.shape_cast %87 : vector<1x8x8xf32> to vector<8x8xf32>
    %89 = arith.mulf %84, %88 : vector<8x8xf32>
    %cst_38 = arith.constant dense<0.000000e+00> : vector<8xf32>
    %90 = vector.multi_reduction <add>, %89, %cst_38 [1] : vector<8x8xf32> to vector<8xf32>
    %91 = vector.shape_cast %90 : vector<8xf32> to vector<8x1xf32>
    %c1_39 = arith.constant 1 : index
    %c0_40 = arith.constant 0 : index
    %c0_41 = arith.constant 0 : index
    %92 = vector.load %arg1[%c1_39, %c0_40, %c0_41] : memref<8x8x8xf32, #tpu.memory_space<vmem>>, vector<1x8x8xf32>
    %93 = vector.shape_cast %92 : vector<1x8x8xf32> to vector<8x8xf32>
    %94 = arith.mulf %84, %93 : vector<8x8xf32>
    %cst_42 = arith.constant dense<0.000000e+00> : vector<8xf32>
    %95 = vector.multi_reduction <add>, %94, %cst_42 [1] : vector<8x8xf32> to vector<8xf32>
    %96 = vector.shape_cast %95 : vector<8xf32> to vector<8x1xf32>
    %c2_43 = arith.constant 2 : index
    %c0_44 = arith.constant 0 : index
    %c0_45 = arith.constant 0 : index
    %97 = vector.load %arg1[%c2_43, %c0_44, %c0_45] : memref<8x8x8xf32, #tpu.memory_space<vmem>>, vector<1x8x8xf32>
    %98 = vector.shape_cast %97 : vector<1x8x8xf32> to vector<8x8xf32>
    %99 = arith.mulf %84, %98 : vector<8x8xf32>
    %cst_46 = arith.constant dense<0.000000e+00> : vector<8xf32>
    %100 = vector.multi_reduction <add>, %99, %cst_46 [1] : vector<8x8xf32> to vector<8xf32>
    %101 = vector.shape_cast %100 : vector<8xf32> to vector<8x1xf32>
    %c3_47 = arith.constant 3 : index
    %c0_48 = arith.constant 0 : index
    %c0_49 = arith.constant 0 : index
    %102 = vector.load %arg1[%c3_47, %c0_48, %c0_49] : memref<8x8x8xf32, #tpu.memory_space<vmem>>, vector<1x8x8xf32>
    %103 = vector.shape_cast %102 : vector<1x8x8xf32> to vector<8x8xf32>
    %104 = arith.mulf %84, %103 : vector<8x8xf32>
    %cst_50 = arith.constant dense<0.000000e+00> : vector<8xf32>
    %105 = vector.multi_reduction <add>, %104, %cst_50 [1] : vector<8x8xf32> to vector<8xf32>
    %106 = vector.shape_cast %105 : vector<8xf32> to vector<8x1xf32>
    %c4_51 = arith.constant 4 : index
    %c0_52 = arith.constant 0 : index
    %c0_53 = arith.constant 0 : index
    %107 = vector.load %arg1[%c4_51, %c0_52, %c0_53] : memref<8x8x8xf32, #tpu.memory_space<vmem>>, vector<1x8x8xf32>
    %108 = vector.shape_cast %107 : vector<1x8x8xf32> to vector<8x8xf32>
    %109 = arith.mulf %84, %108 : vector<8x8xf32>
    %cst_54 = arith.constant dense<0.000000e+00> : vector<8xf32>
    %110 = vector.multi_reduction <add>, %109, %cst_54 [1] : vector<8x8xf32> to vector<8xf32>
    %111 = vector.shape_cast %110 : vector<8xf32> to vector<8x1xf32>
    %c5_55 = arith.constant 5 : index
    %c0_56 = arith.constant 0 : index
    %c0_57 = arith.constant 0 : index
    %112 = vector.load %arg1[%c5_55, %c0_56, %c0_57] : memref<8x8x8xf32, #tpu.memory_space<vmem>>, vector<1x8x8xf32>
    %113 = vector.shape_cast %112 : vector<1x8x8xf32> to vector<8x8xf32>
    %114 = arith.mulf %84, %113 : vector<8x8xf32>
    %cst_58 = arith.constant dense<0.000000e+00> : vector<8xf32>
    %115 = vector.multi_reduction <add>, %114, %cst_58 [1] : vector<8x8xf32> to vector<8xf32>
    %116 = vector.shape_cast %115 : vector<8xf32> to vector<8x1xf32>
    %c6_59 = arith.constant 6 : index
    %c0_60 = arith.constant 0 : index
    %c0_61 = arith.constant 0 : index
    %117 = vector.load %arg1[%c6_59, %c0_60, %c0_61] : memref<8x8x8xf32, #tpu.memory_space<vmem>>, vector<1x8x8xf32>
    %118 = vector.shape_cast %117 : vector<1x8x8xf32> to vector<8x8xf32>
    %119 = arith.mulf %84, %118 : vector<8x8xf32>
    %cst_62 = arith.constant dense<0.000000e+00> : vector<8xf32>
    %120 = vector.multi_reduction <add>, %119, %cst_62 [1] : vector<8x8xf32> to vector<8xf32>
    %121 = vector.shape_cast %120 : vector<8xf32> to vector<8x1xf32>
    %c7_63 = arith.constant 7 : index
    %c0_64 = arith.constant 0 : index
    %c0_65 = arith.constant 0 : index
    %122 = vector.load %arg1[%c7_63, %c0_64, %c0_65] : memref<8x8x8xf32, #tpu.memory_space<vmem>>, vector<1x8x8xf32>
    %123 = vector.shape_cast %122 : vector<1x8x8xf32> to vector<8x8xf32>
    %124 = arith.mulf %84, %123 : vector<8x8xf32>
    %cst_66 = arith.constant dense<0.000000e+00> : vector<8xf32>
    %125 = vector.multi_reduction <add>, %124, %cst_66 [1] : vector<8x8xf32> to vector<8xf32>
    %126 = vector.shape_cast %125 : vector<8xf32> to vector<8x1xf32>
    %127 = tpu.concatenate %91, %96, %101, %106, %111, %116, %121, %126 in 1 : vector<8x1xf32>, vector<8x1xf32>, vector<8x1xf32>, vector<8x1xf32>, vector<8x1xf32>, vector<8x1xf32>, vector<8x1xf32>, vector<8x1xf32> -> vector<8x8xf32>
    %cst_67 = arith.constant dense<0.000000e+00> : vector<8x32xf32>
    %128 = tpu.matmul %127, %9, %cst_67 {dimension_numbers = #tpu.dot_dimension_numbers<[1], [0], [0], [1], [0, 0, 1, 1], [], []>} : vector<8x8xf32>, vector<8x32xf32>, vector<8x32xf32> -> vector<8x32xf32>
    %129 = arith.addf %86, %128 : vector<8x32xf32>
    %cst_68 = arith.constant 5.000000e-01 : f32
    %130 = vector.broadcast %cst_68 : f32 to vector<8x32xf32>
    %131 = arith.mulf %130, %129 : vector<8x32xf32>
    %cst_69 = arith.constant 0.707106769 : f32
    %132 = vector.broadcast %cst_69 : f32 to vector<8x32xf32>
    %133 = arith.mulf %129, %132 : vector<8x32xf32>
    %134 = math.absf %133 : vector<8x32xf32>
    %cst_70 = arith.constant 0.327591091 : f32
    %135 = vector.broadcast %cst_70 : f32 to vector<8x32xf32>
    %136 = arith.mulf %135, %134 : vector<8x32xf32>
    %cst_71 = arith.constant 1.000000e+00 : f32
    %137 = vector.broadcast %cst_71 : f32 to vector<8x32xf32>
    %138 = arith.addf %137, %136 : vector<8x32xf32>
    %cst_72 = arith.constant 1.000000e+00 : f32
    %139 = vector.broadcast %cst_72 : f32 to vector<8x32xf32>
    %140 = arith.divf %139, %138 : vector<8x32xf32>
    %cst_73 = arith.constant 1.06140542 : f32
    %141 = vector.broadcast %cst_73 : f32 to vector<8x32xf32>
    %142 = arith.mulf %140, %141 : vector<8x32xf32>
    %cst_74 = arith.constant -1.45315206 : f32
    %143 = vector.broadcast %cst_74 : f32 to vector<8x32xf32>
    %144 = arith.addf %143, %142 : vector<8x32xf32>
    %145 = arith.mulf %140, %144 : vector<8x32xf32>
    %cst_75 = arith.constant 1.42141378 : f32
    %146 = vector.broadcast %cst_75 : f32 to vector<8x32xf32>
    %147 = arith.addf %146, %145 : vector<8x32xf32>
    %148 = arith.mulf %140, %147 : vector<8x32xf32>
    %cst_76 = arith.constant -0.284496725 : f32
    %149 = vector.broadcast %cst_76 : f32 to vector<8x32xf32>
    %150 = arith.addf %149, %148 : vector<8x32xf32>
    %151 = arith.mulf %140, %150 : vector<8x32xf32>
    %cst_77 = arith.constant 0.254829586 : f32
    %152 = vector.broadcast %cst_77 : f32 to vector<8x32xf32>
    %153 = arith.addf %152, %151 : vector<8x32xf32>
    %154 = arith.mulf %140, %153 : vector<8x32xf32>
    %155 = arith.mulf %133, %133 : vector<8x32xf32>
    %cst_78 = arith.constant 0.000000e+00 : f32
    %156 = vector.broadcast %cst_78 : f32 to vector<8x32xf32>
    %157 = arith.subf %156, %155 : vector<8x32xf32>
    %158 = math.exp %157 : vector<8x32xf32>
    %159 = arith.mulf %154, %158 : vector<8x32xf32>
    %cst_79 = arith.constant 1.000000e+00 : f32
    %160 = vector.broadcast %cst_79 : f32 to vector<8x32xf32>
    %161 = arith.subf %160, %159 : vector<8x32xf32>
    %cst_80 = arith.constant 0.000000e+00 : f32
    %162 = vector.broadcast %cst_80 : f32 to vector<8x32xf32>
    %163 = arith.cmpf oge, %133, %162 : vector<8x32xf32>
    %cst_81 = arith.constant 0.000000e+00 : f32
    %164 = vector.broadcast %cst_81 : f32 to vector<8x32xf32>
    %165 = arith.subf %164, %161 : vector<8x32xf32>
    %166 = arith.select %163, %161, %165 : vector<8x32xi1>, vector<8x32xf32>
    %cst_82 = arith.constant 1.000000e+00 : f32
    %167 = vector.broadcast %cst_82 : f32 to vector<8x32xf32>
    %168 = arith.addf %167, %166 : vector<8x32xf32>
    %169 = arith.mulf %131, %168 : vector<8x32xf32>
    %c0_83 = arith.constant 0 : index
    %c0_84 = arith.constant 0 : index
    %c0_85 = arith.constant 0 : index
    %170 = vector.load %arg6[%c0_83, %c0_84, %c0_85] : memref<3x32x136xf32, #tpu.memory_space<vmem>>, vector<1x32x136xf32>
    %171 = vector.shape_cast %170 : vector<1x32x136xf32> to vector<32x136xf32>
    %c0_86 = arith.constant 0 : index
    %c0_87 = arith.constant 0 : index
    %c0_88 = arith.constant 0 : index
    %172 = vector.load %arg7[%c0_86, %c0_87, %c0_88] : memref<3x1x136xf32, #tpu.memory_space<vmem>>, vector<1x1x136xf32>
    %173 = vector.shape_cast %172 : vector<1x1x136xf32> to vector<1x136xf32>
    %c0_89 = arith.constant 0 : index
    %c0_90 = arith.constant 0 : index
    %c0_91 = arith.constant 0 : index
    %174 = vector.load %arg8[%c0_89, %c0_90, %c0_91] : memref<3x8x32xf32, #tpu.memory_space<vmem>>, vector<1x8x32xf32>
    %175 = vector.shape_cast %174 : vector<1x8x32xf32> to vector<8x32xf32>
    %cst_92 = arith.constant dense<0.000000e+00> : vector<8x136xf32>
    %176 = tpu.matmul %169, %171, %cst_92 {dimension_numbers = #tpu.dot_dimension_numbers<[1], [0], [0], [1], [0, 0, 1, 1], [], []>} : vector<8x32xf32>, vector<32x136xf32>, vector<8x136xf32> -> vector<8x136xf32>
    %177 = vector.broadcast %173 : vector<1x136xf32> to vector<8x136xf32>
    %178 = arith.addf %176, %177 : vector<8x136xf32>
    %179 = vector.extract_strided_slice %178 {offsets = [0, 0], sizes = [8, 32], strides = [1, 1]} : vector<8x136xf32> to vector<8x32xf32>
    %180 = vector.extract_strided_slice %178 {offsets = [0, 32], sizes = [8, 32], strides = [1, 1]} : vector<8x136xf32> to vector<8x32xf32>
    %181 = vector.extract_strided_slice %178 {offsets = [0, 64], sizes = [8, 32], strides = [1, 1]} : vector<8x136xf32> to vector<8x32xf32>
    %182 = vector.extract_strided_slice %178 {offsets = [0, 96], sizes = [8, 32], strides = [1, 1]} : vector<8x136xf32> to vector<8x32xf32>
    %183 = vector.extract_strided_slice %178 {offsets = [0, 128], sizes = [8, 8], strides = [1, 1]} : vector<8x136xf32> to vector<8x8xf32>
    %cst_93 = arith.constant dense<0.000000e+00> : vector<8x8xf32>
    %184 = tpu.matmul %179, %180, %cst_93 {dimension_numbers = #tpu.dot_dimension_numbers<[1], [1], [0], [0], [0, 0, 1, 0], [], []>} : vector<8x32xf32>, vector<8x32xf32>, vector<8x8xf32> -> vector<8x8xf32>
    %c0_94 = arith.constant 0 : index
    %c0_95 = arith.constant 0 : index
    %c0_96 = arith.constant 0 : index
    %185 = vector.load %arg1[%c0_94, %c0_95, %c0_96] : memref<8x8x8xf32, #tpu.memory_space<vmem>>, vector<1x8x8xf32>
    %186 = vector.shape_cast %185 : vector<1x8x8xf32> to vector<8x8xf32>
    %187 = vector.extract_strided_slice %183 {offsets = [0, 0], sizes = [8, 1], strides = [1, 1]} : vector<8x8xf32> to vector<8x1xf32>
    %188 = vector.broadcast %187 : vector<8x1xf32> to vector<8x8xf32>
    %189 = arith.mulf %186, %188 : vector<8x8xf32>
    %c1_97 = arith.constant 1 : index
    %c0_98 = arith.constant 0 : index
    %c0_99 = arith.constant 0 : index
    %190 = vector.load %arg1[%c1_97, %c0_98, %c0_99] : memref<8x8x8xf32, #tpu.memory_space<vmem>>, vector<1x8x8xf32>
    %191 = vector.shape_cast %190 : vector<1x8x8xf32> to vector<8x8xf32>
    %192 = vector.extract_strided_slice %183 {offsets = [0, 1], sizes = [8, 1], strides = [1, 1]} : vector<8x8xf32> to vector<8x1xf32>
    %193 = vector.broadcast %192 : vector<8x1xf32> to vector<8x8xf32>
    %194 = arith.mulf %191, %193 : vector<8x8xf32>
    %195 = arith.addf %189, %194 : vector<8x8xf32>
    %c2_100 = arith.constant 2 : index
    %c0_101 = arith.constant 0 : index
    %c0_102 = arith.constant 0 : index
    %196 = vector.load %arg1[%c2_100, %c0_101, %c0_102] : memref<8x8x8xf32, #tpu.memory_space<vmem>>, vector<1x8x8xf32>
    %197 = vector.shape_cast %196 : vector<1x8x8xf32> to vector<8x8xf32>
    %198 = vector.extract_strided_slice %183 {offsets = [0, 2], sizes = [8, 1], strides = [1, 1]} : vector<8x8xf32> to vector<8x1xf32>
    %199 = vector.broadcast %198 : vector<8x1xf32> to vector<8x8xf32>
    %200 = arith.mulf %197, %199 : vector<8x8xf32>
    %201 = arith.addf %195, %200 : vector<8x8xf32>
    %c3_103 = arith.constant 3 : index
    %c0_104 = arith.constant 0 : index
    %c0_105 = arith.constant 0 : index
    %202 = vector.load %arg1[%c3_103, %c0_104, %c0_105] : memref<8x8x8xf32, #tpu.memory_space<vmem>>, vector<1x8x8xf32>
    %203 = vector.shape_cast %202 : vector<1x8x8xf32> to vector<8x8xf32>
    %204 = vector.extract_strided_slice %183 {offsets = [0, 3], sizes = [8, 1], strides = [1, 1]} : vector<8x8xf32> to vector<8x1xf32>
    %205 = vector.broadcast %204 : vector<8x1xf32> to vector<8x8xf32>
    %206 = arith.mulf %203, %205 : vector<8x8xf32>
    %207 = arith.addf %201, %206 : vector<8x8xf32>
    %c4_106 = arith.constant 4 : index
    %c0_107 = arith.constant 0 : index
    %c0_108 = arith.constant 0 : index
    %208 = vector.load %arg1[%c4_106, %c0_107, %c0_108] : memref<8x8x8xf32, #tpu.memory_space<vmem>>, vector<1x8x8xf32>
    %209 = vector.shape_cast %208 : vector<1x8x8xf32> to vector<8x8xf32>
    %210 = vector.extract_strided_slice %183 {offsets = [0, 4], sizes = [8, 1], strides = [1, 1]} : vector<8x8xf32> to vector<8x1xf32>
    %211 = vector.broadcast %210 : vector<8x1xf32> to vector<8x8xf32>
    %212 = arith.mulf %209, %211 : vector<8x8xf32>
    %213 = arith.addf %207, %212 : vector<8x8xf32>
    %c5_109 = arith.constant 5 : index
    %c0_110 = arith.constant 0 : index
    %c0_111 = arith.constant 0 : index
    %214 = vector.load %arg1[%c5_109, %c0_110, %c0_111] : memref<8x8x8xf32, #tpu.memory_space<vmem>>, vector<1x8x8xf32>
    %215 = vector.shape_cast %214 : vector<1x8x8xf32> to vector<8x8xf32>
    %216 = vector.extract_strided_slice %183 {offsets = [0, 5], sizes = [8, 1], strides = [1, 1]} : vector<8x8xf32> to vector<8x1xf32>
    %217 = vector.broadcast %216 : vector<8x1xf32> to vector<8x8xf32>
    %218 = arith.mulf %215, %217 : vector<8x8xf32>
    %219 = arith.addf %213, %218 : vector<8x8xf32>
    %c6_112 = arith.constant 6 : index
    %c0_113 = arith.constant 0 : index
    %c0_114 = arith.constant 0 : index
    %220 = vector.load %arg1[%c6_112, %c0_113, %c0_114] : memref<8x8x8xf32, #tpu.memory_space<vmem>>, vector<1x8x8xf32>
    %221 = vector.shape_cast %220 : vector<1x8x8xf32> to vector<8x8xf32>
    %222 = vector.extract_strided_slice %183 {offsets = [0, 6], sizes = [8, 1], strides = [1, 1]} : vector<8x8xf32> to vector<8x1xf32>
    %223 = vector.broadcast %222 : vector<8x1xf32> to vector<8x8xf32>
    %224 = arith.mulf %221, %223 : vector<8x8xf32>
    %225 = arith.addf %219, %224 : vector<8x8xf32>
    %c7_115 = arith.constant 7 : index
    %c0_116 = arith.constant 0 : index
    %c0_117 = arith.constant 0 : index
    %226 = vector.load %arg1[%c7_115, %c0_116, %c0_117] : memref<8x8x8xf32, #tpu.memory_space<vmem>>, vector<1x8x8xf32>
    %227 = vector.shape_cast %226 : vector<1x8x8xf32> to vector<8x8xf32>
    %228 = vector.extract_strided_slice %183 {offsets = [0, 7], sizes = [8, 1], strides = [1, 1]} : vector<8x8xf32> to vector<8x1xf32>
    %229 = vector.broadcast %228 : vector<8x1xf32> to vector<8x8xf32>
    %230 = arith.mulf %227, %229 : vector<8x8xf32>
    %231 = arith.addf %225, %230 : vector<8x8xf32>
    %232 = arith.addf %184, %231 : vector<8x8xf32>
    %233 = arith.addf %232, %5 : vector<8x8xf32>
    %cst_118 = arith.constant dense<0xFF800000> : vector<8xf32>
    %234 = vector.multi_reduction <maximumf>, %233, %cst_118 [1] : vector<8x8xf32> to vector<8xf32>
    %235 = vector.shape_cast %234 : vector<8xf32> to vector<8x1xf32>
    %236 = vector.broadcast %235 : vector<8x1xf32> to vector<8x8xf32>
    %237 = arith.subf %233, %236 : vector<8x8xf32>
    %238 = math.exp %237 : vector<8x8xf32>
    %239 = arith.mulf %238, %0 : vector<8x8xf32>
    %cst_119 = arith.constant dense<0.000000e+00> : vector<8xf32>
    %240 = vector.multi_reduction <add>, %239, %cst_119 [1] : vector<8x8xf32> to vector<8xf32>
    %241 = vector.shape_cast %240 : vector<8xf32> to vector<8x1xf32>
    %cst_120 = arith.constant 9.99999968E-21 : f32
    %242 = vector.broadcast %cst_120 : f32 to vector<8x1xf32>
    %243 = arith.maximumf %241, %242 : vector<8x1xf32>
    %244 = tpu.reciprocal %243 {approx = true} : vector<8x1xf32> -> vector<8x1xf32>
    %245 = arith.mulf %243, %244 : vector<8x1xf32>
    %cst_121 = arith.constant 2.000000e+00 : f32
    %246 = vector.broadcast %cst_121 : f32 to vector<8x1xf32>
    %247 = arith.subf %246, %245 : vector<8x1xf32>
    %248 = arith.mulf %244, %247 : vector<8x1xf32>
    %249 = vector.broadcast %248 : vector<8x1xf32> to vector<8x8xf32>
    %250 = arith.mulf %239, %249 : vector<8x8xf32>
    %cst_122 = arith.constant dense<0.000000e+00> : vector<8x32xf32>
    %251 = tpu.matmul %250, %181, %cst_122 {dimension_numbers = #tpu.dot_dimension_numbers<[1], [0], [0], [1], [0, 0, 1, 1], [], []>} : vector<8x8xf32>, vector<8x32xf32>, vector<8x32xf32> -> vector<8x32xf32>
    %252 = arith.addf %251, %182 : vector<8x32xf32>
    %c0_123 = arith.constant 0 : index
    %c0_124 = arith.constant 0 : index
    %c0_125 = arith.constant 0 : index
    %253 = vector.load %arg1[%c0_123, %c0_124, %c0_125] : memref<8x8x8xf32, #tpu.memory_space<vmem>>, vector<1x8x8xf32>
    %254 = vector.shape_cast %253 : vector<1x8x8xf32> to vector<8x8xf32>
    %255 = arith.mulf %250, %254 : vector<8x8xf32>
    %cst_126 = arith.constant dense<0.000000e+00> : vector<8xf32>
    %256 = vector.multi_reduction <add>, %255, %cst_126 [1] : vector<8x8xf32> to vector<8xf32>
    %257 = vector.shape_cast %256 : vector<8xf32> to vector<8x1xf32>
    %c1_127 = arith.constant 1 : index
    %c0_128 = arith.constant 0 : index
    %c0_129 = arith.constant 0 : index
    %258 = vector.load %arg1[%c1_127, %c0_128, %c0_129] : memref<8x8x8xf32, #tpu.memory_space<vmem>>, vector<1x8x8xf32>
    %259 = vector.shape_cast %258 : vector<1x8x8xf32> to vector<8x8xf32>
    %260 = arith.mulf %250, %259 : vector<8x8xf32>
    %cst_130 = arith.constant dense<0.000000e+00> : vector<8xf32>
    %261 = vector.multi_reduction <add>, %260, %cst_130 [1] : vector<8x8xf32> to vector<8xf32>
    %262 = vector.shape_cast %261 : vector<8xf32> to vector<8x1xf32>
    %c2_131 = arith.constant 2 : index
    %c0_132 = arith.constant 0 : index
    %c0_133 = arith.constant 0 : index
    %263 = vector.load %arg1[%c2_131, %c0_132, %c0_133] : memref<8x8x8xf32, #tpu.memory_space<vmem>>, vector<1x8x8xf32>
    %264 = vector.shape_cast %263 : vector<1x8x8xf32> to vector<8x8xf32>
    %265 = arith.mulf %250, %264 : vector<8x8xf32>
    %cst_134 = arith.constant dense<0.000000e+00> : vector<8xf32>
    %266 = vector.multi_reduction <add>, %265, %cst_134 [1] : vector<8x8xf32> to vector<8xf32>
    %267 = vector.shape_cast %266 : vector<8xf32> to vector<8x1xf32>
    %c3_135 = arith.constant 3 : index
    %c0_136 = arith.constant 0 : index
    %c0_137 = arith.constant 0 : index
    %268 = vector.load %arg1[%c3_135, %c0_136, %c0_137] : memref<8x8x8xf32, #tpu.memory_space<vmem>>, vector<1x8x8xf32>
    %269 = vector.shape_cast %268 : vector<1x8x8xf32> to vector<8x8xf32>
    %270 = arith.mulf %250, %269 : vector<8x8xf32>
    %cst_138 = arith.constant dense<0.000000e+00> : vector<8xf32>
    %271 = vector.multi_reduction <add>, %270, %cst_138 [1] : vector<8x8xf32> to vector<8xf32>
    %272 = vector.shape_cast %271 : vector<8xf32> to vector<8x1xf32>
    %c4_139 = arith.constant 4 : index
    %c0_140 = arith.constant 0 : index
    %c0_141 = arith.constant 0 : index
    %273 = vector.load %arg1[%c4_139, %c0_140, %c0_141] : memref<8x8x8xf32, #tpu.memory_space<vmem>>, vector<1x8x8xf32>
    %274 = vector.shape_cast %273 : vector<1x8x8xf32> to vector<8x8xf32>
    %275 = arith.mulf %250, %274 : vector<8x8xf32>
    %cst_142 = arith.constant dense<0.000000e+00> : vector<8xf32>
    %276 = vector.multi_reduction <add>, %275, %cst_142 [1] : vector<8x8xf32> to vector<8xf32>
    %277 = vector.shape_cast %276 : vector<8xf32> to vector<8x1xf32>
    %c5_143 = arith.constant 5 : index
    %c0_144 = arith.constant 0 : index
    %c0_145 = arith.constant 0 : index
    %278 = vector.load %arg1[%c5_143, %c0_144, %c0_145] : memref<8x8x8xf32, #tpu.memory_space<vmem>>, vector<1x8x8xf32>
    %279 = vector.shape_cast %278 : vector<1x8x8xf32> to vector<8x8xf32>
    %280 = arith.mulf %250, %279 : vector<8x8xf32>
    %cst_146 = arith.constant dense<0.000000e+00> : vector<8xf32>
    %281 = vector.multi_reduction <add>, %280, %cst_146 [1] : vector<8x8xf32> to vector<8xf32>
    %282 = vector.shape_cast %281 : vector<8xf32> to vector<8x1xf32>
    %c6_147 = arith.constant 6 : index
    %c0_148 = arith.constant 0 : index
    %c0_149 = arith.constant 0 : index
    %283 = vector.load %arg1[%c6_147, %c0_148, %c0_149] : memref<8x8x8xf32, #tpu.memory_space<vmem>>, vector<1x8x8xf32>
    %284 = vector.shape_cast %283 : vector<1x8x8xf32> to vector<8x8xf32>
    %285 = arith.mulf %250, %284 : vector<8x8xf32>
    %cst_150 = arith.constant dense<0.000000e+00> : vector<8xf32>
    %286 = vector.multi_reduction <add>, %285, %cst_150 [1] : vector<8x8xf32> to vector<8xf32>
    %287 = vector.shape_cast %286 : vector<8xf32> to vector<8x1xf32>
    %c7_151 = arith.constant 7 : index
    %c0_152 = arith.constant 0 : index
    %c0_153 = arith.constant 0 : index
    %288 = vector.load %arg1[%c7_151, %c0_152, %c0_153] : memref<8x8x8xf32, #tpu.memory_space<vmem>>, vector<1x8x8xf32>
    %289 = vector.shape_cast %288 : vector<1x8x8xf32> to vector<8x8xf32>
    %290 = arith.mulf %250, %289 : vector<8x8xf32>
    %cst_154 = arith.constant dense<0.000000e+00> : vector<8xf32>
    %291 = vector.multi_reduction <add>, %290, %cst_154 [1] : vector<8x8xf32> to vector<8xf32>
    %292 = vector.shape_cast %291 : vector<8xf32> to vector<8x1xf32>
    %293 = tpu.concatenate %257, %262, %267, %272, %277, %282, %287, %292 in 1 : vector<8x1xf32>, vector<8x1xf32>, vector<8x1xf32>, vector<8x1xf32>, vector<8x1xf32>, vector<8x1xf32>, vector<8x1xf32>, vector<8x1xf32> -> vector<8x8xf32>
    %cst_155 = arith.constant dense<0.000000e+00> : vector<8x32xf32>
    %294 = tpu.matmul %293, %175, %cst_155 {dimension_numbers = #tpu.dot_dimension_numbers<[1], [0], [0], [1], [0, 0, 1, 1], [], []>} : vector<8x8xf32>, vector<8x32xf32>, vector<8x32xf32> -> vector<8x32xf32>
    %295 = arith.addf %252, %294 : vector<8x32xf32>
    %cst_156 = arith.constant 5.000000e-01 : f32
    %296 = vector.broadcast %cst_156 : f32 to vector<8x32xf32>
    %297 = arith.mulf %296, %295 : vector<8x32xf32>
    %cst_157 = arith.constant 0.707106769 : f32
    %298 = vector.broadcast %cst_157 : f32 to vector<8x32xf32>
    %299 = arith.mulf %295, %298 : vector<8x32xf32>
    %300 = math.absf %299 : vector<8x32xf32>
    %cst_158 = arith.constant 0.327591091 : f32
    %301 = vector.broadcast %cst_158 : f32 to vector<8x32xf32>
    %302 = arith.mulf %301, %300 : vector<8x32xf32>
    %cst_159 = arith.constant 1.000000e+00 : f32
    %303 = vector.broadcast %cst_159 : f32 to vector<8x32xf32>
    %304 = arith.addf %303, %302 : vector<8x32xf32>
    %cst_160 = arith.constant 1.000000e+00 : f32
    %305 = vector.broadcast %cst_160 : f32 to vector<8x32xf32>
    %306 = arith.divf %305, %304 : vector<8x32xf32>
    %cst_161 = arith.constant 1.06140542 : f32
    %307 = vector.broadcast %cst_161 : f32 to vector<8x32xf32>
    %308 = arith.mulf %306, %307 : vector<8x32xf32>
    %cst_162 = arith.constant -1.45315206 : f32
    %309 = vector.broadcast %cst_162 : f32 to vector<8x32xf32>
    %310 = arith.addf %309, %308 : vector<8x32xf32>
    %311 = arith.mulf %306, %310 : vector<8x32xf32>
    %cst_163 = arith.constant 1.42141378 : f32
    %312 = vector.broadcast %cst_163 : f32 to vector<8x32xf32>
    %313 = arith.addf %312, %311 : vector<8x32xf32>
    %314 = arith.mulf %306, %313 : vector<8x32xf32>
    %cst_164 = arith.constant -0.284496725 : f32
    %315 = vector.broadcast %cst_164 : f32 to vector<8x32xf32>
    %316 = arith.addf %315, %314 : vector<8x32xf32>
    %317 = arith.mulf %306, %316 : vector<8x32xf32>
    %cst_165 = arith.constant 0.254829586 : f32
    %318 = vector.broadcast %cst_165 : f32 to vector<8x32xf32>
    %319 = arith.addf %318, %317 : vector<8x32xf32>
    %320 = arith.mulf %306, %319 : vector<8x32xf32>
    %321 = arith.mulf %299, %299 : vector<8x32xf32>
    %cst_166 = arith.constant 0.000000e+00 : f32
    %322 = vector.broadcast %cst_166 : f32 to vector<8x32xf32>
    %323 = arith.subf %322, %321 : vector<8x32xf32>
    %324 = math.exp %323 : vector<8x32xf32>
    %325 = arith.mulf %320, %324 : vector<8x32xf32>
    %cst_167 = arith.constant 1.000000e+00 : f32
    %326 = vector.broadcast %cst_167 : f32 to vector<8x32xf32>
    %327 = arith.subf %326, %325 : vector<8x32xf32>
    %cst_168 = arith.constant 0.000000e+00 : f32
    %328 = vector.broadcast %cst_168 : f32 to vector<8x32xf32>
    %329 = arith.cmpf oge, %299, %328 : vector<8x32xf32>
    %cst_169 = arith.constant 0.000000e+00 : f32
    %330 = vector.broadcast %cst_169 : f32 to vector<8x32xf32>
    %331 = arith.subf %330, %327 : vector<8x32xf32>
    %332 = arith.select %329, %327, %331 : vector<8x32xi1>, vector<8x32xf32>
    %cst_170 = arith.constant 1.000000e+00 : f32
    %333 = vector.broadcast %cst_170 : f32 to vector<8x32xf32>
    %334 = arith.addf %333, %332 : vector<8x32xf32>
    %335 = arith.mulf %297, %334 : vector<8x32xf32>
    %336 = arith.addf %335, %169 : vector<8x32xf32>
    %c1_171 = arith.constant 1 : index
    %c0_172 = arith.constant 0 : index
    %c0_173 = arith.constant 0 : index
    %337 = vector.load %arg6[%c1_171, %c0_172, %c0_173] : memref<3x32x136xf32, #tpu.memory_space<vmem>>, vector<1x32x136xf32>
    %338 = vector.shape_cast %337 : vector<1x32x136xf32> to vector<32x136xf32>
    %c1_174 = arith.constant 1 : index
    %c0_175 = arith.constant 0 : index
    %c0_176 = arith.constant 0 : index
    %339 = vector.load %arg7[%c1_174, %c0_175, %c0_176] : memref<3x1x136xf32, #tpu.memory_space<vmem>>, vector<1x1x136xf32>
    %340 = vector.shape_cast %339 : vector<1x1x136xf32> to vector<1x136xf32>
    %c1_177 = arith.constant 1 : index
    %c0_178 = arith.constant 0 : index
    %c0_179 = arith.constant 0 : index
    %341 = vector.load %arg8[%c1_177, %c0_178, %c0_179] : memref<3x8x32xf32, #tpu.memory_space<vmem>>, vector<1x8x32xf32>
    %342 = vector.shape_cast %341 : vector<1x8x32xf32> to vector<8x32xf32>
    %cst_180 = arith.constant dense<0.000000e+00> : vector<8x136xf32>
    %343 = tpu.matmul %336, %338, %cst_180 {dimension_numbers = #tpu.dot_dimension_numbers<[1], [0], [0], [1], [0, 0, 1, 1], [], []>} : vector<8x32xf32>, vector<32x136xf32>, vector<8x136xf32> -> vector<8x136xf32>
    %344 = vector.broadcast %340 : vector<1x136xf32> to vector<8x136xf32>
    %345 = arith.addf %343, %344 : vector<8x136xf32>
    %346 = vector.extract_strided_slice %345 {offsets = [0, 0], sizes = [8, 32], strides = [1, 1]} : vector<8x136xf32> to vector<8x32xf32>
    %347 = vector.extract_strided_slice %345 {offsets = [0, 32], sizes = [8, 32], strides = [1, 1]} : vector<8x136xf32> to vector<8x32xf32>
    %348 = vector.extract_strided_slice %345 {offsets = [0, 64], sizes = [8, 32], strides = [1, 1]} : vector<8x136xf32> to vector<8x32xf32>
    %349 = vector.extract_strided_slice %345 {offsets = [0, 96], sizes = [8, 32], strides = [1, 1]} : vector<8x136xf32> to vector<8x32xf32>
    %350 = vector.extract_strided_slice %345 {offsets = [0, 128], sizes = [8, 8], strides = [1, 1]} : vector<8x136xf32> to vector<8x8xf32>
    %cst_181 = arith.constant dense<0.000000e+00> : vector<8x8xf32>
    %351 = tpu.matmul %346, %347, %cst_181 {dimension_numbers = #tpu.dot_dimension_numbers<[1], [1], [0], [0], [0, 0, 1, 0], [], []>} : vector<8x32xf32>, vector<8x32xf32>, vector<8x8xf32> -> vector<8x8xf32>
    %c0_182 = arith.constant 0 : index
    %c0_183 = arith.constant 0 : index
    %c0_184 = arith.constant 0 : index
    %352 = vector.load %arg1[%c0_182, %c0_183, %c0_184] : memref<8x8x8xf32, #tpu.memory_space<vmem>>, vector<1x8x8xf32>
    %353 = vector.shape_cast %352 : vector<1x8x8xf32> to vector<8x8xf32>
    %354 = vector.extract_strided_slice %350 {offsets = [0, 0], sizes = [8, 1], strides = [1, 1]} : vector<8x8xf32> to vector<8x1xf32>
    %355 = vector.broadcast %354 : vector<8x1xf32> to vector<8x8xf32>
    %356 = arith.mulf %353, %355 : vector<8x8xf32>
    %c1_185 = arith.constant 1 : index
    %c0_186 = arith.constant 0 : index
    %c0_187 = arith.constant 0 : index
    %357 = vector.load %arg1[%c1_185, %c0_186, %c0_187] : memref<8x8x8xf32, #tpu.memory_space<vmem>>, vector<1x8x8xf32>
    %358 = vector.shape_cast %357 : vector<1x8x8xf32> to vector<8x8xf32>
    %359 = vector.extract_strided_slice %350 {offsets = [0, 1], sizes = [8, 1], strides = [1, 1]} : vector<8x8xf32> to vector<8x1xf32>
    %360 = vector.broadcast %359 : vector<8x1xf32> to vector<8x8xf32>
    %361 = arith.mulf %358, %360 : vector<8x8xf32>
    %362 = arith.addf %356, %361 : vector<8x8xf32>
    %c2_188 = arith.constant 2 : index
    %c0_189 = arith.constant 0 : index
    %c0_190 = arith.constant 0 : index
    %363 = vector.load %arg1[%c2_188, %c0_189, %c0_190] : memref<8x8x8xf32, #tpu.memory_space<vmem>>, vector<1x8x8xf32>
    %364 = vector.shape_cast %363 : vector<1x8x8xf32> to vector<8x8xf32>
    %365 = vector.extract_strided_slice %350 {offsets = [0, 2], sizes = [8, 1], strides = [1, 1]} : vector<8x8xf32> to vector<8x1xf32>
    %366 = vector.broadcast %365 : vector<8x1xf32> to vector<8x8xf32>
    %367 = arith.mulf %364, %366 : vector<8x8xf32>
    %368 = arith.addf %362, %367 : vector<8x8xf32>
    %c3_191 = arith.constant 3 : index
    %c0_192 = arith.constant 0 : index
    %c0_193 = arith.constant 0 : index
    %369 = vector.load %arg1[%c3_191, %c0_192, %c0_193] : memref<8x8x8xf32, #tpu.memory_space<vmem>>, vector<1x8x8xf32>
    %370 = vector.shape_cast %369 : vector<1x8x8xf32> to vector<8x8xf32>
    %371 = vector.extract_strided_slice %350 {offsets = [0, 3], sizes = [8, 1], strides = [1, 1]} : vector<8x8xf32> to vector<8x1xf32>
    %372 = vector.broadcast %371 : vector<8x1xf32> to vector<8x8xf32>
    %373 = arith.mulf %370, %372 : vector<8x8xf32>
    %374 = arith.addf %368, %373 : vector<8x8xf32>
    %c4_194 = arith.constant 4 : index
    %c0_195 = arith.constant 0 : index
    %c0_196 = arith.constant 0 : index
    %375 = vector.load %arg1[%c4_194, %c0_195, %c0_196] : memref<8x8x8xf32, #tpu.memory_space<vmem>>, vector<1x8x8xf32>
    %376 = vector.shape_cast %375 : vector<1x8x8xf32> to vector<8x8xf32>
    %377 = vector.extract_strided_slice %350 {offsets = [0, 4], sizes = [8, 1], strides = [1, 1]} : vector<8x8xf32> to vector<8x1xf32>
    %378 = vector.broadcast %377 : vector<8x1xf32> to vector<8x8xf32>
    %379 = arith.mulf %376, %378 : vector<8x8xf32>
    %380 = arith.addf %374, %379 : vector<8x8xf32>
    %c5_197 = arith.constant 5 : index
    %c0_198 = arith.constant 0 : index
    %c0_199 = arith.constant 0 : index
    %381 = vector.load %arg1[%c5_197, %c0_198, %c0_199] : memref<8x8x8xf32, #tpu.memory_space<vmem>>, vector<1x8x8xf32>
    %382 = vector.shape_cast %381 : vector<1x8x8xf32> to vector<8x8xf32>
    %383 = vector.extract_strided_slice %350 {offsets = [0, 5], sizes = [8, 1], strides = [1, 1]} : vector<8x8xf32> to vector<8x1xf32>
    %384 = vector.broadcast %383 : vector<8x1xf32> to vector<8x8xf32>
    %385 = arith.mulf %382, %384 : vector<8x8xf32>
    %386 = arith.addf %380, %385 : vector<8x8xf32>
    %c6_200 = arith.constant 6 : index
    %c0_201 = arith.constant 0 : index
    %c0_202 = arith.constant 0 : index
    %387 = vector.load %arg1[%c6_200, %c0_201, %c0_202] : memref<8x8x8xf32, #tpu.memory_space<vmem>>, vector<1x8x8xf32>
    %388 = vector.shape_cast %387 : vector<1x8x8xf32> to vector<8x8xf32>
    %389 = vector.extract_strided_slice %350 {offsets = [0, 6], sizes = [8, 1], strides = [1, 1]} : vector<8x8xf32> to vector<8x1xf32>
    %390 = vector.broadcast %389 : vector<8x1xf32> to vector<8x8xf32>
    %391 = arith.mulf %388, %390 : vector<8x8xf32>
    %392 = arith.addf %386, %391 : vector<8x8xf32>
    %c7_203 = arith.constant 7 : index
    %c0_204 = arith.constant 0 : index
    %c0_205 = arith.constant 0 : index
    %393 = vector.load %arg1[%c7_203, %c0_204, %c0_205] : memref<8x8x8xf32, #tpu.memory_space<vmem>>, vector<1x8x8xf32>
    %394 = vector.shape_cast %393 : vector<1x8x8xf32> to vector<8x8xf32>
    %395 = vector.extract_strided_slice %350 {offsets = [0, 7], sizes = [8, 1], strides = [1, 1]} : vector<8x8xf32> to vector<8x1xf32>
    %396 = vector.broadcast %395 : vector<8x1xf32> to vector<8x8xf32>
    %397 = arith.mulf %394, %396 : vector<8x8xf32>
    %398 = arith.addf %392, %397 : vector<8x8xf32>
    %399 = arith.addf %351, %398 : vector<8x8xf32>
    %400 = arith.addf %399, %5 : vector<8x8xf32>
    %cst_206 = arith.constant dense<0xFF800000> : vector<8xf32>
    %401 = vector.multi_reduction <maximumf>, %400, %cst_206 [1] : vector<8x8xf32> to vector<8xf32>
    %402 = vector.shape_cast %401 : vector<8xf32> to vector<8x1xf32>
    %403 = vector.broadcast %402 : vector<8x1xf32> to vector<8x8xf32>
    %404 = arith.subf %400, %403 : vector<8x8xf32>
    %405 = math.exp %404 : vector<8x8xf32>
    %406 = arith.mulf %405, %0 : vector<8x8xf32>
    %cst_207 = arith.constant dense<0.000000e+00> : vector<8xf32>
    %407 = vector.multi_reduction <add>, %406, %cst_207 [1] : vector<8x8xf32> to vector<8xf32>
    %408 = vector.shape_cast %407 : vector<8xf32> to vector<8x1xf32>
    %cst_208 = arith.constant 9.99999968E-21 : f32
    %409 = vector.broadcast %cst_208 : f32 to vector<8x1xf32>
    %410 = arith.maximumf %408, %409 : vector<8x1xf32>
    %411 = tpu.reciprocal %410 {approx = true} : vector<8x1xf32> -> vector<8x1xf32>
    %412 = arith.mulf %410, %411 : vector<8x1xf32>
    %cst_209 = arith.constant 2.000000e+00 : f32
    %413 = vector.broadcast %cst_209 : f32 to vector<8x1xf32>
    %414 = arith.subf %413, %412 : vector<8x1xf32>
    %415 = arith.mulf %411, %414 : vector<8x1xf32>
    %416 = vector.broadcast %415 : vector<8x1xf32> to vector<8x8xf32>
    %417 = arith.mulf %406, %416 : vector<8x8xf32>
    %cst_210 = arith.constant dense<0.000000e+00> : vector<8x32xf32>
    %418 = tpu.matmul %417, %348, %cst_210 {dimension_numbers = #tpu.dot_dimension_numbers<[1], [0], [0], [1], [0, 0, 1, 1], [], []>} : vector<8x8xf32>, vector<8x32xf32>, vector<8x32xf32> -> vector<8x32xf32>
    %419 = arith.addf %418, %349 : vector<8x32xf32>
    %c0_211 = arith.constant 0 : index
    %c0_212 = arith.constant 0 : index
    %c0_213 = arith.constant 0 : index
    %420 = vector.load %arg1[%c0_211, %c0_212, %c0_213] : memref<8x8x8xf32, #tpu.memory_space<vmem>>, vector<1x8x8xf32>
    %421 = vector.shape_cast %420 : vector<1x8x8xf32> to vector<8x8xf32>
    %422 = arith.mulf %417, %421 : vector<8x8xf32>
    %cst_214 = arith.constant dense<0.000000e+00> : vector<8xf32>
    %423 = vector.multi_reduction <add>, %422, %cst_214 [1] : vector<8x8xf32> to vector<8xf32>
    %424 = vector.shape_cast %423 : vector<8xf32> to vector<8x1xf32>
    %c1_215 = arith.constant 1 : index
    %c0_216 = arith.constant 0 : index
    %c0_217 = arith.constant 0 : index
    %425 = vector.load %arg1[%c1_215, %c0_216, %c0_217] : memref<8x8x8xf32, #tpu.memory_space<vmem>>, vector<1x8x8xf32>
    %426 = vector.shape_cast %425 : vector<1x8x8xf32> to vector<8x8xf32>
    %427 = arith.mulf %417, %426 : vector<8x8xf32>
    %cst_218 = arith.constant dense<0.000000e+00> : vector<8xf32>
    %428 = vector.multi_reduction <add>, %427, %cst_218 [1] : vector<8x8xf32> to vector<8xf32>
    %429 = vector.shape_cast %428 : vector<8xf32> to vector<8x1xf32>
    %c2_219 = arith.constant 2 : index
    %c0_220 = arith.constant 0 : index
    %c0_221 = arith.constant 0 : index
    %430 = vector.load %arg1[%c2_219, %c0_220, %c0_221] : memref<8x8x8xf32, #tpu.memory_space<vmem>>, vector<1x8x8xf32>
    %431 = vector.shape_cast %430 : vector<1x8x8xf32> to vector<8x8xf32>
    %432 = arith.mulf %417, %431 : vector<8x8xf32>
    %cst_222 = arith.constant dense<0.000000e+00> : vector<8xf32>
    %433 = vector.multi_reduction <add>, %432, %cst_222 [1] : vector<8x8xf32> to vector<8xf32>
    %434 = vector.shape_cast %433 : vector<8xf32> to vector<8x1xf32>
    %c3_223 = arith.constant 3 : index
    %c0_224 = arith.constant 0 : index
    %c0_225 = arith.constant 0 : index
    %435 = vector.load %arg1[%c3_223, %c0_224, %c0_225] : memref<8x8x8xf32, #tpu.memory_space<vmem>>, vector<1x8x8xf32>
    %436 = vector.shape_cast %435 : vector<1x8x8xf32> to vector<8x8xf32>
    %437 = arith.mulf %417, %436 : vector<8x8xf32>
    %cst_226 = arith.constant dense<0.000000e+00> : vector<8xf32>
    %438 = vector.multi_reduction <add>, %437, %cst_226 [1] : vector<8x8xf32> to vector<8xf32>
    %439 = vector.shape_cast %438 : vector<8xf32> to vector<8x1xf32>
    %c4_227 = arith.constant 4 : index
    %c0_228 = arith.constant 0 : index
    %c0_229 = arith.constant 0 : index
    %440 = vector.load %arg1[%c4_227, %c0_228, %c0_229] : memref<8x8x8xf32, #tpu.memory_space<vmem>>, vector<1x8x8xf32>
    %441 = vector.shape_cast %440 : vector<1x8x8xf32> to vector<8x8xf32>
    %442 = arith.mulf %417, %441 : vector<8x8xf32>
    %cst_230 = arith.constant dense<0.000000e+00> : vector<8xf32>
    %443 = vector.multi_reduction <add>, %442, %cst_230 [1] : vector<8x8xf32> to vector<8xf32>
    %444 = vector.shape_cast %443 : vector<8xf32> to vector<8x1xf32>
    %c5_231 = arith.constant 5 : index
    %c0_232 = arith.constant 0 : index
    %c0_233 = arith.constant 0 : index
    %445 = vector.load %arg1[%c5_231, %c0_232, %c0_233] : memref<8x8x8xf32, #tpu.memory_space<vmem>>, vector<1x8x8xf32>
    %446 = vector.shape_cast %445 : vector<1x8x8xf32> to vector<8x8xf32>
    %447 = arith.mulf %417, %446 : vector<8x8xf32>
    %cst_234 = arith.constant dense<0.000000e+00> : vector<8xf32>
    %448 = vector.multi_reduction <add>, %447, %cst_234 [1] : vector<8x8xf32> to vector<8xf32>
    %449 = vector.shape_cast %448 : vector<8xf32> to vector<8x1xf32>
    %c6_235 = arith.constant 6 : index
    %c0_236 = arith.constant 0 : index
    %c0_237 = arith.constant 0 : index
    %450 = vector.load %arg1[%c6_235, %c0_236, %c0_237] : memref<8x8x8xf32, #tpu.memory_space<vmem>>, vector<1x8x8xf32>
    %451 = vector.shape_cast %450 : vector<1x8x8xf32> to vector<8x8xf32>
    %452 = arith.mulf %417, %451 : vector<8x8xf32>
    %cst_238 = arith.constant dense<0.000000e+00> : vector<8xf32>
    %453 = vector.multi_reduction <add>, %452, %cst_238 [1] : vector<8x8xf32> to vector<8xf32>
    %454 = vector.shape_cast %453 : vector<8xf32> to vector<8x1xf32>
    %c7_239 = arith.constant 7 : index
    %c0_240 = arith.constant 0 : index
    %c0_241 = arith.constant 0 : index
    %455 = vector.load %arg1[%c7_239, %c0_240, %c0_241] : memref<8x8x8xf32, #tpu.memory_space<vmem>>, vector<1x8x8xf32>
    %456 = vector.shape_cast %455 : vector<1x8x8xf32> to vector<8x8xf32>
    %457 = arith.mulf %417, %456 : vector<8x8xf32>
    %cst_242 = arith.constant dense<0.000000e+00> : vector<8xf32>
    %458 = vector.multi_reduction <add>, %457, %cst_242 [1] : vector<8x8xf32> to vector<8xf32>
    %459 = vector.shape_cast %458 : vector<8xf32> to vector<8x1xf32>
    %460 = tpu.concatenate %424, %429, %434, %439, %444, %449, %454, %459 in 1 : vector<8x1xf32>, vector<8x1xf32>, vector<8x1xf32>, vector<8x1xf32>, vector<8x1xf32>, vector<8x1xf32>, vector<8x1xf32>, vector<8x1xf32> -> vector<8x8xf32>
    %cst_243 = arith.constant dense<0.000000e+00> : vector<8x32xf32>
    %461 = tpu.matmul %460, %342, %cst_243 {dimension_numbers = #tpu.dot_dimension_numbers<[1], [0], [0], [1], [0, 0, 1, 1], [], []>} : vector<8x8xf32>, vector<8x32xf32>, vector<8x32xf32> -> vector<8x32xf32>
    %462 = arith.addf %419, %461 : vector<8x32xf32>
    %cst_244 = arith.constant 5.000000e-01 : f32
    %463 = vector.broadcast %cst_244 : f32 to vector<8x32xf32>
    %464 = arith.mulf %463, %462 : vector<8x32xf32>
    %cst_245 = arith.constant 0.707106769 : f32
    %465 = vector.broadcast %cst_245 : f32 to vector<8x32xf32>
    %466 = arith.mulf %462, %465 : vector<8x32xf32>
    %467 = math.absf %466 : vector<8x32xf32>
    %cst_246 = arith.constant 0.327591091 : f32
    %468 = vector.broadcast %cst_246 : f32 to vector<8x32xf32>
    %469 = arith.mulf %468, %467 : vector<8x32xf32>
    %cst_247 = arith.constant 1.000000e+00 : f32
    %470 = vector.broadcast %cst_247 : f32 to vector<8x32xf32>
    %471 = arith.addf %470, %469 : vector<8x32xf32>
    %cst_248 = arith.constant 1.000000e+00 : f32
    %472 = vector.broadcast %cst_248 : f32 to vector<8x32xf32>
    %473 = arith.divf %472, %471 : vector<8x32xf32>
    %cst_249 = arith.constant 1.06140542 : f32
    %474 = vector.broadcast %cst_249 : f32 to vector<8x32xf32>
    %475 = arith.mulf %473, %474 : vector<8x32xf32>
    %cst_250 = arith.constant -1.45315206 : f32
    %476 = vector.broadcast %cst_250 : f32 to vector<8x32xf32>
    %477 = arith.addf %476, %475 : vector<8x32xf32>
    %478 = arith.mulf %473, %477 : vector<8x32xf32>
    %cst_251 = arith.constant 1.42141378 : f32
    %479 = vector.broadcast %cst_251 : f32 to vector<8x32xf32>
    %480 = arith.addf %479, %478 : vector<8x32xf32>
    %481 = arith.mulf %473, %480 : vector<8x32xf32>
    %cst_252 = arith.constant -0.284496725 : f32
    %482 = vector.broadcast %cst_252 : f32 to vector<8x32xf32>
    %483 = arith.addf %482, %481 : vector<8x32xf32>
    %484 = arith.mulf %473, %483 : vector<8x32xf32>
    %cst_253 = arith.constant 0.254829586 : f32
    %485 = vector.broadcast %cst_253 : f32 to vector<8x32xf32>
    %486 = arith.addf %485, %484 : vector<8x32xf32>
    %487 = arith.mulf %473, %486 : vector<8x32xf32>
    %488 = arith.mulf %466, %466 : vector<8x32xf32>
    %cst_254 = arith.constant 0.000000e+00 : f32
    %489 = vector.broadcast %cst_254 : f32 to vector<8x32xf32>
    %490 = arith.subf %489, %488 : vector<8x32xf32>
    %491 = math.exp %490 : vector<8x32xf32>
    %492 = arith.mulf %487, %491 : vector<8x32xf32>
    %cst_255 = arith.constant 1.000000e+00 : f32
    %493 = vector.broadcast %cst_255 : f32 to vector<8x32xf32>
    %494 = arith.subf %493, %492 : vector<8x32xf32>
    %cst_256 = arith.constant 0.000000e+00 : f32
    %495 = vector.broadcast %cst_256 : f32 to vector<8x32xf32>
    %496 = arith.cmpf oge, %466, %495 : vector<8x32xf32>
    %cst_257 = arith.constant 0.000000e+00 : f32
    %497 = vector.broadcast %cst_257 : f32 to vector<8x32xf32>
    %498 = arith.subf %497, %494 : vector<8x32xf32>
    %499 = arith.select %496, %494, %498 : vector<8x32xi1>, vector<8x32xf32>
    %cst_258 = arith.constant 1.000000e+00 : f32
    %500 = vector.broadcast %cst_258 : f32 to vector<8x32xf32>
    %501 = arith.addf %500, %499 : vector<8x32xf32>
    %502 = arith.mulf %464, %501 : vector<8x32xf32>
    %503 = arith.addf %502, %336 : vector<8x32xf32>
    %c2_259 = arith.constant 2 : index
    %c0_260 = arith.constant 0 : index
    %c0_261 = arith.constant 0 : index
    %504 = vector.load %arg6[%c2_259, %c0_260, %c0_261] : memref<3x32x136xf32, #tpu.memory_space<vmem>>, vector<1x32x136xf32>
    %505 = vector.shape_cast %504 : vector<1x32x136xf32> to vector<32x136xf32>
    %c2_262 = arith.constant 2 : index
    %c0_263 = arith.constant 0 : index
    %c0_264 = arith.constant 0 : index
    %506 = vector.load %arg7[%c2_262, %c0_263, %c0_264] : memref<3x1x136xf32, #tpu.memory_space<vmem>>, vector<1x1x136xf32>
    %507 = vector.shape_cast %506 : vector<1x1x136xf32> to vector<1x136xf32>
    %c2_265 = arith.constant 2 : index
    %c0_266 = arith.constant 0 : index
    %c0_267 = arith.constant 0 : index
    %508 = vector.load %arg8[%c2_265, %c0_266, %c0_267] : memref<3x8x32xf32, #tpu.memory_space<vmem>>, vector<1x8x32xf32>
    %509 = vector.shape_cast %508 : vector<1x8x32xf32> to vector<8x32xf32>
    %cst_268 = arith.constant dense<0.000000e+00> : vector<8x136xf32>
    %510 = tpu.matmul %503, %505, %cst_268 {dimension_numbers = #tpu.dot_dimension_numbers<[1], [0], [0], [1], [0, 0, 1, 1], [], []>} : vector<8x32xf32>, vector<32x136xf32>, vector<8x136xf32> -> vector<8x136xf32>
    %511 = vector.broadcast %507 : vector<1x136xf32> to vector<8x136xf32>
    %512 = arith.addf %510, %511 : vector<8x136xf32>
    %513 = vector.extract_strided_slice %512 {offsets = [0, 0], sizes = [8, 32], strides = [1, 1]} : vector<8x136xf32> to vector<8x32xf32>
    %514 = vector.extract_strided_slice %512 {offsets = [0, 32], sizes = [8, 32], strides = [1, 1]} : vector<8x136xf32> to vector<8x32xf32>
    %515 = vector.extract_strided_slice %512 {offsets = [0, 64], sizes = [8, 32], strides = [1, 1]} : vector<8x136xf32> to vector<8x32xf32>
    %516 = vector.extract_strided_slice %512 {offsets = [0, 96], sizes = [8, 32], strides = [1, 1]} : vector<8x136xf32> to vector<8x32xf32>
    %517 = vector.extract_strided_slice %512 {offsets = [0, 128], sizes = [8, 8], strides = [1, 1]} : vector<8x136xf32> to vector<8x8xf32>
    %cst_269 = arith.constant dense<0.000000e+00> : vector<8x8xf32>
    %518 = tpu.matmul %513, %514, %cst_269 {dimension_numbers = #tpu.dot_dimension_numbers<[1], [1], [0], [0], [0, 0, 1, 0], [], []>} : vector<8x32xf32>, vector<8x32xf32>, vector<8x8xf32> -> vector<8x8xf32>
    %c0_270 = arith.constant 0 : index
    %c0_271 = arith.constant 0 : index
    %c0_272 = arith.constant 0 : index
    %519 = vector.load %arg1[%c0_270, %c0_271, %c0_272] : memref<8x8x8xf32, #tpu.memory_space<vmem>>, vector<1x8x8xf32>
    %520 = vector.shape_cast %519 : vector<1x8x8xf32> to vector<8x8xf32>
    %521 = vector.extract_strided_slice %517 {offsets = [0, 0], sizes = [8, 1], strides = [1, 1]} : vector<8x8xf32> to vector<8x1xf32>
    %522 = vector.broadcast %521 : vector<8x1xf32> to vector<8x8xf32>
    %523 = arith.mulf %520, %522 : vector<8x8xf32>
    %c1_273 = arith.constant 1 : index
    %c0_274 = arith.constant 0 : index
    %c0_275 = arith.constant 0 : index
    %524 = vector.load %arg1[%c1_273, %c0_274, %c0_275] : memref<8x8x8xf32, #tpu.memory_space<vmem>>, vector<1x8x8xf32>
    %525 = vector.shape_cast %524 : vector<1x8x8xf32> to vector<8x8xf32>
    %526 = vector.extract_strided_slice %517 {offsets = [0, 1], sizes = [8, 1], strides = [1, 1]} : vector<8x8xf32> to vector<8x1xf32>
    %527 = vector.broadcast %526 : vector<8x1xf32> to vector<8x8xf32>
    %528 = arith.mulf %525, %527 : vector<8x8xf32>
    %529 = arith.addf %523, %528 : vector<8x8xf32>
    %c2_276 = arith.constant 2 : index
    %c0_277 = arith.constant 0 : index
    %c0_278 = arith.constant 0 : index
    %530 = vector.load %arg1[%c2_276, %c0_277, %c0_278] : memref<8x8x8xf32, #tpu.memory_space<vmem>>, vector<1x8x8xf32>
    %531 = vector.shape_cast %530 : vector<1x8x8xf32> to vector<8x8xf32>
    %532 = vector.extract_strided_slice %517 {offsets = [0, 2], sizes = [8, 1], strides = [1, 1]} : vector<8x8xf32> to vector<8x1xf32>
    %533 = vector.broadcast %532 : vector<8x1xf32> to vector<8x8xf32>
    %534 = arith.mulf %531, %533 : vector<8x8xf32>
    %535 = arith.addf %529, %534 : vector<8x8xf32>
    %c3_279 = arith.constant 3 : index
    %c0_280 = arith.constant 0 : index
    %c0_281 = arith.constant 0 : index
    %536 = vector.load %arg1[%c3_279, %c0_280, %c0_281] : memref<8x8x8xf32, #tpu.memory_space<vmem>>, vector<1x8x8xf32>
    %537 = vector.shape_cast %536 : vector<1x8x8xf32> to vector<8x8xf32>
    %538 = vector.extract_strided_slice %517 {offsets = [0, 3], sizes = [8, 1], strides = [1, 1]} : vector<8x8xf32> to vector<8x1xf32>
    %539 = vector.broadcast %538 : vector<8x1xf32> to vector<8x8xf32>
    %540 = arith.mulf %537, %539 : vector<8x8xf32>
    %541 = arith.addf %535, %540 : vector<8x8xf32>
    %c4_282 = arith.constant 4 : index
    %c0_283 = arith.constant 0 : index
    %c0_284 = arith.constant 0 : index
    %542 = vector.load %arg1[%c4_282, %c0_283, %c0_284] : memref<8x8x8xf32, #tpu.memory_space<vmem>>, vector<1x8x8xf32>
    %543 = vector.shape_cast %542 : vector<1x8x8xf32> to vector<8x8xf32>
    %544 = vector.extract_strided_slice %517 {offsets = [0, 4], sizes = [8, 1], strides = [1, 1]} : vector<8x8xf32> to vector<8x1xf32>
    %545 = vector.broadcast %544 : vector<8x1xf32> to vector<8x8xf32>
    %546 = arith.mulf %543, %545 : vector<8x8xf32>
    %547 = arith.addf %541, %546 : vector<8x8xf32>
    %c5_285 = arith.constant 5 : index
    %c0_286 = arith.constant 0 : index
    %c0_287 = arith.constant 0 : index
    %548 = vector.load %arg1[%c5_285, %c0_286, %c0_287] : memref<8x8x8xf32, #tpu.memory_space<vmem>>, vector<1x8x8xf32>
    %549 = vector.shape_cast %548 : vector<1x8x8xf32> to vector<8x8xf32>
    %550 = vector.extract_strided_slice %517 {offsets = [0, 5], sizes = [8, 1], strides = [1, 1]} : vector<8x8xf32> to vector<8x1xf32>
    %551 = vector.broadcast %550 : vector<8x1xf32> to vector<8x8xf32>
    %552 = arith.mulf %549, %551 : vector<8x8xf32>
    %553 = arith.addf %547, %552 : vector<8x8xf32>
    %c6_288 = arith.constant 6 : index
    %c0_289 = arith.constant 0 : index
    %c0_290 = arith.constant 0 : index
    %554 = vector.load %arg1[%c6_288, %c0_289, %c0_290] : memref<8x8x8xf32, #tpu.memory_space<vmem>>, vector<1x8x8xf32>
    %555 = vector.shape_cast %554 : vector<1x8x8xf32> to vector<8x8xf32>
    %556 = vector.extract_strided_slice %517 {offsets = [0, 6], sizes = [8, 1], strides = [1, 1]} : vector<8x8xf32> to vector<8x1xf32>
    %557 = vector.broadcast %556 : vector<8x1xf32> to vector<8x8xf32>
    %558 = arith.mulf %555, %557 : vector<8x8xf32>
    %559 = arith.addf %553, %558 : vector<8x8xf32>
    %c7_291 = arith.constant 7 : index
    %c0_292 = arith.constant 0 : index
    %c0_293 = arith.constant 0 : index
    %560 = vector.load %arg1[%c7_291, %c0_292, %c0_293] : memref<8x8x8xf32, #tpu.memory_space<vmem>>, vector<1x8x8xf32>
    %561 = vector.shape_cast %560 : vector<1x8x8xf32> to vector<8x8xf32>
    %562 = vector.extract_strided_slice %517 {offsets = [0, 7], sizes = [8, 1], strides = [1, 1]} : vector<8x8xf32> to vector<8x1xf32>
    %563 = vector.broadcast %562 : vector<8x1xf32> to vector<8x8xf32>
    %564 = arith.mulf %561, %563 : vector<8x8xf32>
    %565 = arith.addf %559, %564 : vector<8x8xf32>
    %566 = arith.addf %518, %565 : vector<8x8xf32>
    %567 = arith.addf %566, %5 : vector<8x8xf32>
    %cst_294 = arith.constant dense<0xFF800000> : vector<8xf32>
    %568 = vector.multi_reduction <maximumf>, %567, %cst_294 [1] : vector<8x8xf32> to vector<8xf32>
    %569 = vector.shape_cast %568 : vector<8xf32> to vector<8x1xf32>
    %570 = vector.broadcast %569 : vector<8x1xf32> to vector<8x8xf32>
    %571 = arith.subf %567, %570 : vector<8x8xf32>
    %572 = math.exp %571 : vector<8x8xf32>
    %573 = arith.mulf %572, %0 : vector<8x8xf32>
    %cst_295 = arith.constant dense<0.000000e+00> : vector<8xf32>
    %574 = vector.multi_reduction <add>, %573, %cst_295 [1] : vector<8x8xf32> to vector<8xf32>
    %575 = vector.shape_cast %574 : vector<8xf32> to vector<8x1xf32>
    %cst_296 = arith.constant 9.99999968E-21 : f32
    %576 = vector.broadcast %cst_296 : f32 to vector<8x1xf32>
    %577 = arith.maximumf %575, %576 : vector<8x1xf32>
    %578 = tpu.reciprocal %577 {approx = true} : vector<8x1xf32> -> vector<8x1xf32>
    %579 = arith.mulf %577, %578 : vector<8x1xf32>
    %cst_297 = arith.constant 2.000000e+00 : f32
    %580 = vector.broadcast %cst_297 : f32 to vector<8x1xf32>
    %581 = arith.subf %580, %579 : vector<8x1xf32>
    %582 = arith.mulf %578, %581 : vector<8x1xf32>
    %583 = vector.broadcast %582 : vector<8x1xf32> to vector<8x8xf32>
    %584 = arith.mulf %573, %583 : vector<8x8xf32>
    %cst_298 = arith.constant dense<0.000000e+00> : vector<8x32xf32>
    %585 = tpu.matmul %584, %515, %cst_298 {dimension_numbers = #tpu.dot_dimension_numbers<[1], [0], [0], [1], [0, 0, 1, 1], [], []>} : vector<8x8xf32>, vector<8x32xf32>, vector<8x32xf32> -> vector<8x32xf32>
    %586 = arith.addf %585, %516 : vector<8x32xf32>
    %c0_299 = arith.constant 0 : index
    %c0_300 = arith.constant 0 : index
    %c0_301 = arith.constant 0 : index
    %587 = vector.load %arg1[%c0_299, %c0_300, %c0_301] : memref<8x8x8xf32, #tpu.memory_space<vmem>>, vector<1x8x8xf32>
    %588 = vector.shape_cast %587 : vector<1x8x8xf32> to vector<8x8xf32>
    %589 = arith.mulf %584, %588 : vector<8x8xf32>
    %cst_302 = arith.constant dense<0.000000e+00> : vector<8xf32>
    %590 = vector.multi_reduction <add>, %589, %cst_302 [1] : vector<8x8xf32> to vector<8xf32>
    %591 = vector.shape_cast %590 : vector<8xf32> to vector<8x1xf32>
    %c1_303 = arith.constant 1 : index
    %c0_304 = arith.constant 0 : index
    %c0_305 = arith.constant 0 : index
    %592 = vector.load %arg1[%c1_303, %c0_304, %c0_305] : memref<8x8x8xf32, #tpu.memory_space<vmem>>, vector<1x8x8xf32>
    %593 = vector.shape_cast %592 : vector<1x8x8xf32> to vector<8x8xf32>
    %594 = arith.mulf %584, %593 : vector<8x8xf32>
    %cst_306 = arith.constant dense<0.000000e+00> : vector<8xf32>
    %595 = vector.multi_reduction <add>, %594, %cst_306 [1] : vector<8x8xf32> to vector<8xf32>
    %596 = vector.shape_cast %595 : vector<8xf32> to vector<8x1xf32>
    %c2_307 = arith.constant 2 : index
    %c0_308 = arith.constant 0 : index
    %c0_309 = arith.constant 0 : index
    %597 = vector.load %arg1[%c2_307, %c0_308, %c0_309] : memref<8x8x8xf32, #tpu.memory_space<vmem>>, vector<1x8x8xf32>
    %598 = vector.shape_cast %597 : vector<1x8x8xf32> to vector<8x8xf32>
    %599 = arith.mulf %584, %598 : vector<8x8xf32>
    %cst_310 = arith.constant dense<0.000000e+00> : vector<8xf32>
    %600 = vector.multi_reduction <add>, %599, %cst_310 [1] : vector<8x8xf32> to vector<8xf32>
    %601 = vector.shape_cast %600 : vector<8xf32> to vector<8x1xf32>
    %c3_311 = arith.constant 3 : index
    %c0_312 = arith.constant 0 : index
    %c0_313 = arith.constant 0 : index
    %602 = vector.load %arg1[%c3_311, %c0_312, %c0_313] : memref<8x8x8xf32, #tpu.memory_space<vmem>>, vector<1x8x8xf32>
    %603 = vector.shape_cast %602 : vector<1x8x8xf32> to vector<8x8xf32>
    %604 = arith.mulf %584, %603 : vector<8x8xf32>
    %cst_314 = arith.constant dense<0.000000e+00> : vector<8xf32>
    %605 = vector.multi_reduction <add>, %604, %cst_314 [1] : vector<8x8xf32> to vector<8xf32>
    %606 = vector.shape_cast %605 : vector<8xf32> to vector<8x1xf32>
    %c4_315 = arith.constant 4 : index
    %c0_316 = arith.constant 0 : index
    %c0_317 = arith.constant 0 : index
    %607 = vector.load %arg1[%c4_315, %c0_316, %c0_317] : memref<8x8x8xf32, #tpu.memory_space<vmem>>, vector<1x8x8xf32>
    %608 = vector.shape_cast %607 : vector<1x8x8xf32> to vector<8x8xf32>
    %609 = arith.mulf %584, %608 : vector<8x8xf32>
    %cst_318 = arith.constant dense<0.000000e+00> : vector<8xf32>
    %610 = vector.multi_reduction <add>, %609, %cst_318 [1] : vector<8x8xf32> to vector<8xf32>
    %611 = vector.shape_cast %610 : vector<8xf32> to vector<8x1xf32>
    %c5_319 = arith.constant 5 : index
    %c0_320 = arith.constant 0 : index
    %c0_321 = arith.constant 0 : index
    %612 = vector.load %arg1[%c5_319, %c0_320, %c0_321] : memref<8x8x8xf32, #tpu.memory_space<vmem>>, vector<1x8x8xf32>
    %613 = vector.shape_cast %612 : vector<1x8x8xf32> to vector<8x8xf32>
    %614 = arith.mulf %584, %613 : vector<8x8xf32>
    %cst_322 = arith.constant dense<0.000000e+00> : vector<8xf32>
    %615 = vector.multi_reduction <add>, %614, %cst_322 [1] : vector<8x8xf32> to vector<8xf32>
    %616 = vector.shape_cast %615 : vector<8xf32> to vector<8x1xf32>
    %c6_323 = arith.constant 6 : index
    %c0_324 = arith.constant 0 : index
    %c0_325 = arith.constant 0 : index
    %617 = vector.load %arg1[%c6_323, %c0_324, %c0_325] : memref<8x8x8xf32, #tpu.memory_space<vmem>>, vector<1x8x8xf32>
    %618 = vector.shape_cast %617 : vector<1x8x8xf32> to vector<8x8xf32>
    %619 = arith.mulf %584, %618 : vector<8x8xf32>
    %cst_326 = arith.constant dense<0.000000e+00> : vector<8xf32>
    %620 = vector.multi_reduction <add>, %619, %cst_326 [1] : vector<8x8xf32> to vector<8xf32>
    %621 = vector.shape_cast %620 : vector<8xf32> to vector<8x1xf32>
    %c7_327 = arith.constant 7 : index
    %c0_328 = arith.constant 0 : index
    %c0_329 = arith.constant 0 : index
    %622 = vector.load %arg1[%c7_327, %c0_328, %c0_329] : memref<8x8x8xf32, #tpu.memory_space<vmem>>, vector<1x8x8xf32>
    %623 = vector.shape_cast %622 : vector<1x8x8xf32> to vector<8x8xf32>
    %624 = arith.mulf %584, %623 : vector<8x8xf32>
    %cst_330 = arith.constant dense<0.000000e+00> : vector<8xf32>
    %625 = vector.multi_reduction <add>, %624, %cst_330 [1] : vector<8x8xf32> to vector<8xf32>
    %626 = vector.shape_cast %625 : vector<8xf32> to vector<8x1xf32>
    %627 = tpu.concatenate %591, %596, %601, %606, %611, %616, %621, %626 in 1 : vector<8x1xf32>, vector<8x1xf32>, vector<8x1xf32>, vector<8x1xf32>, vector<8x1xf32>, vector<8x1xf32>, vector<8x1xf32>, vector<8x1xf32> -> vector<8x8xf32>
    %cst_331 = arith.constant dense<0.000000e+00> : vector<8x32xf32>
    %628 = tpu.matmul %627, %509, %cst_331 {dimension_numbers = #tpu.dot_dimension_numbers<[1], [0], [0], [1], [0, 0, 1, 1], [], []>} : vector<8x8xf32>, vector<8x32xf32>, vector<8x32xf32> -> vector<8x32xf32>
    %629 = arith.addf %586, %628 : vector<8x32xf32>
    %c0_332 = arith.constant 0 : index
    %c0_333 = arith.constant 0 : index
    %630 = vector.load %arg9[%c0_332, %c0_333] : memref<8x32xf32, #tpu.memory_space<vmem>>, vector<8x32xf32>
    tpu.vector_store %arg9[%c0_332, %c0_333], %629 {strides = array<i32>} : memref<8x32xf32, #tpu.memory_space<vmem>>, vector<8x32xf32>,
    return
  }
}

</mosaic_0001>

<bundles_post_ra>
// kernel: net_coor_forward.1
= control target key start
LH: loop header
LB: loop body
LE: loop exit
PB: predicated region body
PF: predicated region fallthrough
CT: control target
= control target key end

     0   :  { %v2121_v3 = vmov 0.0   ;;  %vm53_vm0 = vcmask 130048   ;;  %v2122_v8 = vmov 1   ;;  %v2123_v9 = vmov 0   ;;  %s2125_s19 = smov 96   ;;  %s2133_s16 = smov 64   ;;  %s2645_s3 = inlined_call_operand.vmem [shape: f32[16,136], index: 3, kind: input, shape index: {}]   ;;  %s2646_s0 = inlined_call_operand.vmem [shape: f32[8,16], index: 0, kind: input, shape index: {}]   ;;  %s2647_s4 = inlined_call_operand.vmem [shape: f32[1,136], index: 4, kind: input, shape index: {}]   ;;  %s2648_s1 = inlined_call_operand.vmem [shape: f32[8,8,8], index: 1, kind: input, shape index: {}]   ;;  %s2649_s2 = inlined_call_operand.vmem [shape: f32[8,8], index: 2, kind: input, shape index: {}]   ;;  %s2650_s5 = inlined_call_operand.vmem [shape: f32[8,32], index: 5, kind: input, shape index: {}]   ;;  %s2651_s6 = inlined_call_operand.vmem [shape: f32[3,32,136], index: 6, kind: input, shape index: {}]   ;;  %s2652_s7 = inlined_call_operand.vmem [shape: f32[3,1,136], index: 7, kind: input, shape index: {}]   ;;  %s2653_s8 = inlined_call_operand.vmem [shape: f32[3,8,32], index: 8, kind: input, shape index: {}]   ;;  %s2654_s9 = inlined_call_operand.vmem [shape: f32[8,32], index: 9, kind: output, shape index: {}]  }
   0x1   :  { %v37_v0 = vld [vmem:[%s2645_s3 + $0x8] sm:$0xff]  ;;  %v39_v1 = vld [vmem:[%s2645_s3 + $0x18] sm:$0xff]  ;;  %v36_v2 = vld [vmem:[%s2645_s3] sm:$0xff]  ;;  %121 = vmatprep.mubr.f32.mxu0 %v2121_v3  ;;  %1938 = vmatprep.subr.mxu1 %v2121_v3  ;;  %v43_v10 = vlaneseq  ;;  %vm2124_vm1 = vmmov 0   ;;  %v2126_v21 = vmov 2   ;;  %v2127_v22 = vmov 4  }
   0x2   :  { %v1998_v4 = vpack.c.bf16 %v39_v1, %v37_v0  ;;  %v38_v5 = vld [vmem:[%s2645_s3 + $0x10] sm:$0xff]  ;;  %v35_v7 = vld [vmem:[%s2646_s0] sm:$0xff]  ;;  %2053 = vset.pattern.permute.xlu1 %v2122_v8  ;;  %2052 = vset.pattern.permute.xlu0 %v2123_v9  ;;  %v2128_v23 = vmov 3   ;;  %v2129_v24 = vmov 7   ;;  %v2130_v25 = vmov 5   ;;  %v2242_v32 = vld [vmem:[%s2648_s1 + $0x8] sm:$0xff] }
   0x3   :  { %v2000_v6 = vpack.c.bf16 %v38_v5, %v36_v2  ;;  %v44_v11 = vshrl.u32 %v43_v10, 7  ;;  %1940 = vmatprep.mubr.msk.f32.mxu1 %vm2124_vm1, %v2121_v3  ;;  %v40_v13 = vld [vmem:[%s2647_s4] sm:$0x3]  ;;  %v2131_v26 = vmov 6   ;;  %vm194_vm2 = vcmask 261120   ;;  %v2248_v34 = vld [vmem:[%s2648_s1 + $0x10] sm:$0xff] }
   0x4   :  { %1999 = vmatprep.subr.bf16.mxu0 %v1998_v4  ;;  %v2237_v30 = vld [vmem:[%s2648_s1] sm:$0xff]  ;;  %v2254_v37 = vld [vmem:[%s2648_s1 + $0x18] sm:$0xff]  ;;  %v2266_v46 = vld [vmem:[%s2648_s1 + $0x28] sm:$0xff]  ;;  %v2132_v61 = vmov -1e+30   ;;  %vm270_vm4 = vcmask 64512  }
   0x5   :  { %2001 = vmatpush1.bf16.msra.mxu0 %v2000_v6  ;;  %v2209_v12 = vsub.s32 0, %v44_v11  ;;  %v2214_v14 = vsub.s32 1, %v44_v11  ;;  %v2261_v43 = vld [vmem:[%s2648_s1 + $0x20] sm:$0xff]  ;;  %v2272_v48 = vld [vmem:[%s2648_s1 + $0x30] sm:$0xff]  ;;  %v2279_v54 = vld [vmem:[%s2648_s1 + $0x38] sm:$0xff]  ;;  %s2134_s17 = smov 32  }
   0x6   :  { %1943 = vmatprep.subr.mxu0 %v2121_v3  ;;  %v2284_v56 = vld [vmem:[%s2649_s2] sm:$0xff]  ;;  %vm398_vm5 = vcmask 7168   ;;  %vm400_vm6 = vcmask 15360   ;;  %vm402_vm7 = vcmask 23552   ;;  %vm404_vm8 = vcmask 31744  }
   0x7   :  { %v46_v15 = vrot.slane %v40_v13, %v2209_v12  ;;  %v50_v16 = vrot.slane %v40_v13, %v2214_v14  ;;  %vm33_vm3 = vcmp.gt.f32.partialorder %v2284_v56, 0.0  ;;  %vm406_vm9 = vcmask 39936  }
   0x8   :  { %1867 = vmatmul.mubr.msk.f32.vlgmr.msra.gmra.mrb[0].mxu0 %vm53_vm0, %v35_v7  ;;  %v2288_v62 = vsel %vm33_vm3, 0.0, %v2132_v61  ;;  %vm408_vm10 = vcmask 48128   ;;  %vm410_vm11 = vcmask 56320  }
   0x9   :  { %1945 = vmatprep.mubr.msk.f32.mxu0 %vm2124_vm1, %v2121_v3 }
  0xdb   :  { %v123_v17 = vpop.f32.mrb[0].mxu0 }
  0xdc   :  { %v2218_v18 = vadd.f32 %v123_v17, %v46_v15  ;;  %v125_v19 = vpop.f32.mrb[1].mxu0 }
  0xdd   :  { %v126_v20 = vadd.f32 %v125_v19, %v50_v16 }
  0xde   :  { %192 = vrot.lane.b32.xlu0 %v2218_v18, %s2125_s19 }
  0xdf   :  { %138 = vperm.xlu1 %2053, %v126_v20  }
  0xe2   :  { %131 = vperm.xlu0 %2052, %v126_v20  }
  0xe3   :  { %2054 = vset.pattern.permute.xlu1 %v2126_v21 }
  0xe4   :  { %146 = vperm.xlu1 %2054, %v126_v20  }
  0xe6   :  { %2056 = vset.pattern.permute.xlu0 %v2127_v22 }
  0xe7   :  { %162 = vperm.xlu0 %2056, %v126_v20  }
  0xe8   :  { %2055 = vset.pattern.permute.xlu1 %v2128_v23 }
  0xe9   :  { %154 = vperm.xlu1 %2055, %v126_v20  }
  0xeb   :  { %2059 = vset.pattern.permute.xlu0 %v2129_v24 }
  0xec   :  { %186 = vperm.xlu0 %2059, %v126_v20  }
  0xed   :  { %2057 = vset.pattern.permute.xlu1 %v2130_v25 }
  0xee   :  { %170 = vperm.xlu1 %2057, %v126_v20  }
  0xf0   :  { %2061 = vset.pattern.permute.xlu0 %v2122_v8 }
  0xf2   :  { %2058 = vset.pattern.permute.xlu1 %v2131_v26 }
  0xf3   :  { %178 = vperm.xlu1 %2058, %v126_v20  }
  0xf7   :  { %2060 = vset.pattern.permute.xlu1 %v2123_v9 }
 0x150   :  { %v193_v27 = vpop.permute.xlu0 %192 }
 0x151   :  { %1939 = vmatpush3.xpose.msk.msra.mxu1 %vm194_vm2, %v193_v27 }
 0x154   :  { %1941 = vmatmul.mubr.msk.f32.vlgmr.msra.gmra.mrb[0].mxu1 %vm194_vm2, %v2218_v18 }
 0x155   :  { %601 = vmatprep.mubr.f32.mxu1 %v2121_v3 }
 0x15e   :  { %v139_v28 = vpop.permute.xlu1 %138 }
 0x15f   :  { %v141_v36 = vmul.f32 %v2242_v32, %v139_v28 }
 0x161   :  { %v132_v31 = vpop.permute.xlu0 %131 }
 0x162   :  { %v134_v33 = vmul.f32 %v132_v31, %v2237_v30 }
 0x163   :  { %v147_v29 = vpop.permute.xlu1 %146 }
 0x164   :  { %v142_v38 = vadd.f32 %v141_v36, %v134_v33  ;;  %v149_v39 = vmul.f32 %v2248_v34, %v147_v29 }
 0x166   :  { %v150_v42 = vadd.f32 %v149_v39, %v142_v38  ;;  %v163_v44 = vpop.permute.xlu0 %162 }
 0x167   :  { %v165_v47 = vmul.f32 %v2261_v43, %v163_v44 }
 0x168   :  { %v155_v35 = vpop.permute.xlu1 %154 }
 0x169   :  { %v157_v40 = vmul.f32 %v2254_v37, %v155_v35 }
 0x16b   :  { %v158_v45 = vadd.f32 %v157_v40, %v150_v42  ;;  %v187_v55 = vpop.permute.xlu0 %186 }
 0x16c   :  { %v189_v58 = vmul.f32 %v2279_v54, %v187_v55 }
 0x16d   :  { %v171_v41 = vpop.permute.xlu1 %170  ;;  %v166_v50 = vadd.f32 %v165_v47, %v158_v45 }
 0x16e   :  { %v173_v51 = vmul.f32 %v2266_v46, %v171_v41 }
 0x170   :  { %v174_v53 = vadd.f32 %v173_v51, %v166_v50 }
 0x172   :  { %v179_v49 = vpop.permute.xlu1 %178 }
 0x173   :  { %v181_v52 = vmul.f32 %v2272_v48, %v179_v49 }
 0x175   :  { %v182_v57 = vadd.f32 %v181_v52, %v174_v53 }
 0x177   :  { %v190_v59 = vadd.f32 %v189_v58, %v182_v57 }
 0x227   :  { %v265_v60 = vpop.f32.mrb[0].mxu1 }
 0x228   :  { %v266_v63 = vadd.f32 %v265_v60, %v190_v59  ;;  %v1942_v0 = vpop.f32.mrb[1].mxu1 }
 0x22a   :  { %v269_v1 = vadd.f32 %v266_v63, %v2288_v62 }
 0x22c   :  { %v271_v2 = vsel %vm270_vm4, %v269_v1, -inf }
 0x22d   :  { %272 = vmax.xlane.f32.xlu1 %v271_v2 }
 0x2ba   :  { %v273_v4 = vpop.xlane.xlu1 %272 }
 0x2bb   :  { %v274_v5 = vsub.f32 %v269_v1, %v273_v4 }
 0x2bd   :  { %v275_v6 = vmul.f32 1.442695, %v274_v5 }
 0x2bf   :  { %2084 = vpow2.f32 %v275_v6 }
 0x2c9   :  { %v2085_v7 = vpop.eup %2084 }
 0x2ca   :  { %v277_v10 = vmul.f32 %v2085_v7, %v2284_v56  ;;  %v514_v7 = vld [vmem:[%s2651_s6 + $0x8] sm:$0xff] }
 0x2cc   :  { %v278_v11 = vsel %vm270_vm4, %v277_v10, 0.0 }
 0x2cd   :  { %279 = vadd.xlane.f32.xlu0 %v278_v11 }
 0x35a   :  { %v280_v13 = vpop.xlane.xlu0 %279 }
 0x35b   :  { %v281_v15 = vmax.f32 %v280_v13, 1e-20  ;;  %v513_v13 = vld [vmem:[%s2651_s6] sm:$0xff] }
 0x35d   :  { %2086 = vrcp.f32 %v281_v15 }
 0x367   :  { %v2087_v16 = vpop.eup %2086 }
 0x368   :  { %v283_v17 = vmul.f32 %v2087_v16, %v281_v15  ;;  %v515_v15 = vld [vmem:[%s2651_s6 + $0x10] sm:$0xff] }
 0x36a   :  { %v284_v19 = vsub.f32 2.0, %v283_v17  ;;  %v518_v17 = vld [vmem:[%s2651_s6 + $0x28] sm:$0xff] }
 0x36c   :  { %v285_v20 = vmul.f32 %v2087_v16, %v284_v19  ;;  %v2004_v16 = vpack.c.bf16 %v515_v15, %v513_v13  ;;  %v520_v19 = vld [vmem:[%s2651_s6 + $0x38] sm:$0xff] }
 0x36e   :  { %v286_v27 = vmul.f32 %v285_v20, %v277_v10  ;;  %v516_v10 = vld [vmem:[%s2651_s6 + $0x18] sm:$0xff]  ;;  %v2006_v20 = vpack.c.bf16 %v520_v19, %v518_v17 }
 0x36f   :  { %v2002_v11 = vpack.c.bf16 %v516_v10, %v514_v7 }
 0x370   :  { %v370_v28 = vmul.f32 %v2242_v32, %v286_v27  ;;  %v366_v29 = vmul.f32 %v286_v27, %v2237_v30  ;;  %v378_v35 = vmul.f32 %v2254_v37, %v286_v27  ;;  %v374_v36 = vmul.f32 %v2248_v34, %v286_v27 }
 0x371   :  { %v386_v40 = vmul.f32 %v2266_v46, %v286_v27  ;;  %v382_v41 = vmul.f32 %v2261_v43, %v286_v27  ;;  %v394_v45 = vmul.f32 %v2279_v54, %v286_v27  ;;  %v390_v47 = vmul.f32 %v2272_v48, %v286_v27  ;;  %2003 = vmatprep.subr.bf16.mxu1 %v2002_v11 }
 0x372   :  { %v371_v31 = vsel %vm270_vm4, %v370_v28, 0.0  ;;  %v367_v33 = vsel %vm270_vm4, %v366_v29, 0.0  ;;  %v379_v38 = vsel %vm270_vm4, %v378_v35, 0.0  ;;  %v375_v39 = vsel %vm270_vm4, %v374_v36, 0.0  ;;  %2005 = vmatpush1.bf16.msra.mxu1 %v2004_v16  ;;  %v519_v28 = vld [vmem:[%s2651_s6 + $0x30] sm:$0xff] }
 0x373   :  { %372 = vadd.xlane.f32.xlu0 %v371_v31  ;;  %368 = vadd.xlane.f32.xlu1 %v367_v33  ;;  %v387_v42 = vsel %vm270_vm4, %v386_v40, 0.0  ;;  %v383_v44 = vsel %vm270_vm4, %v382_v41, 0.0  ;;  %v395_v49 = vsel %vm270_vm4, %v394_v45, 0.0  ;;  %v391_v50 = vsel %vm270_vm4, %v390_v47, 0.0 }
 0x374   :  { %2007 = vmatprep.subr.bf16.mxu1 %v2006_v20 }
 0x377   :  { %380 = vadd.xlane.f32.xlu0 %v379_v38  ;;  %376 = vadd.xlane.f32.xlu1 %v375_v39 }
 0x37b   :  { %388 = vadd.xlane.f32.xlu0 %v387_v42  ;;  %384 = vadd.xlane.f32.xlu1 %v383_v44 }
 0x37f   :  { %396 = vadd.xlane.f32.xlu0 %v395_v49  ;;  %392 = vadd.xlane.f32.xlu1 %v391_v50 }
 0x390   :  { %287 = vrot.lane.b32.xlu1 %v2218_v18, %s2133_s16 }
 0x395   :  { %290 = vrot.lane.b32.xlu0 %v2218_v18, %s2134_s17  ;;  %v41_v18 = vld [vmem:[%s2650_s5] sm:$0xff] }
 0x400   :  { %v369_v51 = vpop.xlane.xlu1 %368  ;;  %v373_v52 = vpop.xlane.xlu0 %372 }
 0x401   :  { %v399_v59 = vsel %vm398_vm5, %v369_v51, %v373_v52 }
 0x404   :  { %v377_v53 = vpop.xlane.xlu1 %376  ;;  %v381_v57 = vpop.xlane.xlu0 %380 }
 0x405   :  { %v401_v60 = vsel %vm400_vm6, %v399_v59, %v377_v53 }
 0x406   :  { %v403_v0 = vsel %vm402_vm7, %v401_v60, %v381_v57 }
 0x408   :  { %v385_v55 = vpop.xlane.xlu1 %384  ;;  %v389_v61 = vpop.xlane.xlu0 %388 }
 0x409   :  { %v405_v1 = vsel %vm404_vm8, %v403_v0, %v385_v55 }
 0x40a   :  { %v407_v2 = vsel %vm406_vm9, %v405_v1, %v389_v61 }
 0x40c   :  { %v393_v58 = vpop.xlane.xlu1 %392  ;;  %v397_v4 = vpop.xlane.xlu0 %396 }
 0x40d   :  { %v409_v5 = vsel %vm408_vm10, %v407_v2, %v393_v58 }
 0x40e   :  { %v411_v6 = vsel %vm410_vm11, %v409_v5, %v397_v4  ;;  %v521_v5 = vld [vmem:[%s2652_s7] sm:$0x3] }
 0x40f   :  { %v531_v7 = vrot.slane %v521_v5, %v2214_v14 }
 0x410   :  { %v288_v63 = vpop.permute.xlu1 %287  ;;  %v291_v31 = vpop.permute.xlu0 %290 }
 0x411   :  { %1944 = vmatpush3.msra.mxu0 %v288_v63 }
 0x412   :  { %1946 = vmatmul.mubr.msk.f32.vlgmr.msra.gmra.mrb[2].mxu0 %vm270_vm4, %v286_v27  ;;  %1948 = vmatprep.subr.mxu0 %v2121_v3  ;;  %v517_v27 = vld [vmem:[%s2651_s6 + $0x20] sm:$0xff] }
 0x413   :  { %1949 = vmatpush3.msra.mxu0 %v41_v18  ;;  %1950 = vmatprep.mubr.msk.f32.mxu0 %vm2124_vm1, %v2121_v3  ;;  %v2008_v29 = vpack.c.bf16 %v519_v28, %v517_v27 }
 0x414   :  { %1953 = vmatprep.subr.mxu0 %v2121_v3 }
 0x415   :  { %2009 = vmatpush1.bf16.msra.mxu1 %v2008_v29 }
 0x416   :  { %1958 = vmatprep.subr.mxu1 %v2121_v3 }
 0x41a   :  { %1951 = vmatmul.mubr.msk.f32.vlgmr.msra.gmra.mrb[2].mxu0 %vm270_vm4, %v411_v6  ;;  %v527_v6 = vrot.slane %v521_v5, %v2209_v12 }
 0x41b   :  { %1955 = vmatprep.mubr.msk.f32.mxu0 %vm2124_vm1, %v2121_v3 }
 0x4ed   :  { %v481_v33 = vpop.f32.mrb[2].mxu0 }
 0x4ee   :  { %v2026_v35 = vadd.f32 %v481_v33, %v291_v31  ;;  %v1952_v36 = vpop.f32.mrb[3].mxu0 }
 0x4f0   :  { %v487_v38 = vmul.f32 0.70710677, %v2026_v35  ;;  %v486_v1 = vmul.f32 0.5, %v2026_v35 }
 0x4f2   :  { %v488_v39 = vand.u32 2147483647, %v487_v38  ;;  %v502_v42 = vmul.f32 %v487_v38, %v487_v38  ;;  %vm508_vm12 = vcmp.ge.f32.partialorder %v487_v38, 0.0 }
 0x4f4   :  { %v489_v40 = vmul.f32 0.3275911, %v488_v39  ;;  %v503_v45 = vsub.f32 0.0, %v502_v42 }
 0x4f6   :  { %v490_v41 = vadd.f32 1.0, %v489_v40  ;;  %v504_v50 = vmul.f32 1.442695, %v503_v45 }
 0x4f8   :  { %2088 = vrcp.f32 %v490_v41 }
 0x4f9   :  { %2090 = vpow2.f32 %v504_v50 }
 0x502   :  { %v2089_v44 = vpop.eup %2088 }
 0x503   :  { %v493_v47 = vmul.f32 1.0614054, %v2089_v44  ;;  %v2091_v60 = vpop.eup %2090 }
 0x505   :  { %v494_v49 = vadd.f32 -1.4531521, %v493_v47 }
 0x507   :  { %v495_v51 = vmul.f32 %v2089_v44, %v494_v49 }
 0x509   :  { %v496_v52 = vadd.f32 1.4214138, %v495_v51 }
 0x50b   :  { %v497_v53 = vmul.f32 %v2089_v44, %v496_v52 }
 0x50d   :  { %v498_v55 = vadd.f32 -0.28449672, %v497_v53 }
 0x50f   :  { %v499_v57 = vmul.f32 %v2089_v44, %v498_v55 }
 0x511   :  { %v500_v58 = vadd.f32 0.2548296, %v499_v57 }
 0x513   :  { %v501_v59 = vmul.f32 %v2089_v44, %v500_v58 }
 0x515   :  { %v506_v61 = vmul.f32 %v2091_v60, %v501_v59 }
 0x517   :  { %v507_v63 = vsub.f32 1.0, %v506_v61 }
 0x519   :  { %v509_v18 = vsub.f32 0.0, %v507_v63 }
 0x51b   :  { %v510_v0 = vsel %vm508_vm12, %v507_v63, %v509_v18 }
 0x51c   :  { %v511_v2 = vadd.f32 1.0, %v510_v0 }
 0x51e   :  { %v2357_v4 = vmul.f32 %v511_v2, %v486_v1 }
 0x520   :  { %1879 = vmatmul.mubr.msk.f32.vlgmr.msra.gmra.mrb[2].mxu1 %vm194_vm2, %v2357_v4 }
 0x521   :  { %1960 = vmatprep.mubr.msk.f32.mxu1 %vm2124_vm1, %v2121_v3 }
 0x5f3   :  { %v603_v10 = vpop.f32.mrb[2].mxu1 }
 0x5f4   :  { %v2368_v11 = vadd.f32 %v603_v10, %v527_v6  ;;  %v605_v13 = vpop.f32.mrb[3].mxu1 }
 0x5f5   :  { %v606_v15 = vadd.f32 %v605_v13, %v531_v7 }
 0x5f6   :  { %657 = vrot.lane.b32.xlu1 %v2368_v11, %s2125_s19 }
 0x5f7   :  { %615 = vperm.xlu0 %2061, %v606_v15  }
 0x5fa   :  { %610 = vperm.xlu1 %2060, %v606_v15  }
 0x5fb   :  { %2064 = vset.pattern.permute.xlu0 %v2127_v22 }
 0x5fc   :  { %633 = vperm.xlu0 %2064, %v606_v15  }
 0x5fe   :  { %2062 = vset.pattern.permute.xlu1 %v2126_v21 }
 0x5ff   :  { %621 = vperm.xlu1 %2062, %v606_v15  }
 0x600   :  { %2067 = vset.pattern.permute.xlu0 %v2129_v24 }
 0x601   :  { %651 = vperm.xlu0 %2067, %v606_v15  }
 0x603   :  { %2063 = vset.pattern.permute.xlu1 %v2128_v23 }
 0x604   :  { %627 = vperm.xlu1 %2063, %v606_v15  }
 0x605   :  { %2069 = vset.pattern.permute.xlu0 %v2122_v8 }
 0x608   :  { %2065 = vset.pattern.permute.xlu1 %v2130_v25 }
 0x609   :  { %639 = vperm.xlu1 %2065, %v606_v15  }
 0x60d   :  { %2066 = vset.pattern.permute.xlu1 %v2131_v26 }
 0x60e   :  { %645 = vperm.xlu1 %2066, %v606_v15  }
 0x612   :  { %2068 = vset.pattern.permute.xlu1 %v2123_v9 }
 0x668   :  { %v658_v16 = vpop.permute.xlu1 %657 }
 0x669   :  { %1954 = vmatpush3.xpose.msk.msra.mxu0 %vm194_vm2, %v658_v16 }
 0x66c   :  { %1956 = vmatmul.mubr.msk.f32.vlgmr.msra.gmra.mrb[4].mxu0 %vm194_vm2, %v2368_v11 }
 0x66d   :  { %1061 = vmatprep.mubr.f32.mxu0 %v2121_v3 }
 0x676   :  { %v616_v20 = vpop.permute.xlu0 %615 }
 0x677   :  { %v618_v29 = vmul.f32 %v2242_v32, %v616_v20 }
 0x679   :  { %v611_v17 = vpop.permute.xlu1 %610 }
 0x67a   :  { %v613_v28 = vmul.f32 %v611_v17, %v2237_v30 }
 0x67b   :  { %v634_v39 = vpop.permute.xlu0 %633 }
 0x67c   :  { %v619_v33 = vadd.f32 %v618_v29, %v613_v28  ;;  %v636_v41 = vmul.f32 %v2261_v43, %v634_v39 }
 0x67e   :  { %v622_v19 = vpop.permute.xlu1 %621 }
 0x67f   :  { %v624_v31 = vmul.f32 %v2248_v34, %v622_v19 }
 0x680   :  { %v652_v50 = vpop.permute.xlu0 %651 }
 0x681   :  { %v625_v38 = vadd.f32 %v624_v31, %v619_v33  ;;  %v654_v52 = vmul.f32 %v2279_v54, %v652_v50 }
 0x683   :  { %v628_v27 = vpop.permute.xlu1 %627 }
 0x684   :  { %v630_v35 = vmul.f32 %v2254_v37, %v628_v27 }
 0x686   :  { %v631_v40 = vadd.f32 %v630_v35, %v625_v38 }
 0x688   :  { %v640_v36 = vpop.permute.xlu1 %639  ;;  %v637_v44 = vadd.f32 %v636_v41, %v631_v40 }
 0x689   :  { %v642_v45 = vmul.f32 %v2266_v46, %v640_v36 }
 0x68b   :  { %v643_v49 = vadd.f32 %v642_v45, %v637_v44 }
 0x68d   :  { %v646_v42 = vpop.permute.xlu1 %645 }
 0x68e   :  { %v648_v47 = vmul.f32 %v2272_v48, %v646_v42 }
 0x690   :  { %v649_v51 = vadd.f32 %v648_v47, %v643_v49 }
 0x692   :  { %v655_v53 = vadd.f32 %v654_v52, %v649_v51 }
 0x73f   :  { %v729_v55 = vpop.f32.mrb[4].mxu0 }
 0x740   :  { %v730_v57 = vadd.f32 %v729_v55, %v655_v53  ;;  %v1957_v58 = vpop.f32.mrb[5].mxu0 }
 0x742   :  { %v733_v59 = vadd.f32 %v730_v57, %v2288_v62 }
 0x744   :  { %v734_v60 = vsel %vm270_vm4, %v733_v59, -inf }
 0x745   :  { %735 = vmax.xlane.f32.xlu1 %v734_v60 }
 0x7d2   :  { %v736_v61 = vpop.xlane.xlu1 %735 }
 0x7d3   :  { %v737_v63 = vsub.f32 %v733_v59, %v736_v61  ;;  %v522_v59 = vld [vmem:[%s2653_s8] sm:$0xff] }
 0x7d5   :  { %v738_v18 = vmul.f32 1.442695, %v737_v63 }
 0x7d7   :  { %2092 = vpow2.f32 %v738_v18 }
 0x7e1   :  { %v2093_v0 = vpop.eup %2092 }
 0x7e2   :  { %v740_v1 = vmul.f32 %v2093_v0, %v2284_v56 }
 0x7e4   :  { %v741_v2 = vsel %vm270_vm4, %v740_v1, 0.0 }
 0x7e5   :  { %742 = vadd.xlane.f32.xlu0 %v741_v2  ;;  %v1887_v2 = vld [vmem:[%s2651_s6 + $0x58] sm:$0xff] }
 0x872   :  { %v743_v5 = vpop.xlane.xlu0 %742 }
 0x873   :  { %v744_v6 = vmax.f32 %v743_v5, 1e-20 }
 0x875   :  { %2094 = vrcp.f32 %v744_v6 }
 0x87f   :  { %v2095_v7 = vpop.eup %2094 }
 0x880   :  { %v746_v10 = vmul.f32 %v2095_v7, %v744_v6  ;;  %v1884_v6 = vld [vmem:[%s2651_s6 + $0x40] sm:$0xff] }
 0x882   :  { %v747_v13 = vsub.f32 2.0, %v746_v10 }
 0x884   :  { %v748_v15 = vmul.f32 %v2095_v7, %v747_v13  ;;  %v1886_v7 = vld [vmem:[%s2651_s6 + $0x50] sm:$0xff]  ;;  %v1889_v13 = vld [vmem:[%s2651_s6 + $0x68] sm:$0xff] }
 0x885   :  { %v2012_v10 = vpack.c.bf16 %v1886_v7, %v1884_v6 }
 0x886   :  { %v749_v16 = vmul.f32 %v748_v15, %v740_v1  ;;  %v1885_v1 = vld [vmem:[%s2651_s6 + $0x48] sm:$0xff]  ;;  %v1891_v15 = vld [vmem:[%s2651_s6 + $0x78] sm:$0xff] }
 0x887   :  { %v2010_v5 = vpack.c.bf16 %v1887_v2, %v1885_v1  ;;  %v1892_v1 = vld [vmem:[%s2652_s7 + $0x2] sm:$0x3] }
 0x888   :  { %v833_v17 = vmul.f32 %v2242_v32, %v749_v16  ;;  %v829_v19 = vmul.f32 %v749_v16, %v2237_v30  ;;  %v841_v28 = vmul.f32 %v2254_v37, %v749_v16  ;;  %v837_v29 = vmul.f32 %v2248_v34, %v749_v16 }
 0x889   :  { %v849_v35 = vmul.f32 %v2266_v46, %v749_v16  ;;  %v845_v36 = vmul.f32 %v2261_v43, %v749_v16  ;;  %v857_v40 = vmul.f32 %v2279_v54, %v749_v16  ;;  %v853_v41 = vmul.f32 %v2272_v48, %v749_v16  ;;  %2011 = vmatprep.subr.bf16.mxu0 %v2010_v5 }
 0x88a   :  { %v834_v20 = vsel %vm270_vm4, %v833_v17, 0.0  ;;  %v830_v27 = vsel %vm270_vm4, %v829_v19, 0.0  ;;  %v842_v31 = vsel %vm270_vm4, %v841_v28, 0.0  ;;  %v838_v33 = vsel %vm270_vm4, %v837_v29, 0.0  ;;  %2013 = vmatpush1.bf16.msra.mxu0 %v2012_v10  ;;  %v1888_v17 = vld [vmem:[%s2651_s6 + $0x60] sm:$0xff]  ;;  %v1890_v19 = vld [vmem:[%s2651_s6 + $0x70] sm:$0xff] }
 0x88b   :  { %835 = vadd.xlane.f32.xlu0 %v834_v20  ;;  %831 = vadd.xlane.f32.xlu1 %v830_v27  ;;  %v850_v38 = vsel %vm270_vm4, %v849_v35, 0.0  ;;  %v846_v39 = vsel %vm270_vm4, %v845_v36, 0.0  ;;  %v858_v42 = vsel %vm270_vm4, %v857_v40, 0.0  ;;  %v854_v44 = vsel %vm270_vm4, %v853_v41, 0.0 }
 0x88c   :  { %v2016_v20 = vpack.c.bf16 %v1890_v19, %v1888_v17  ;;  %v987_v2 = vrot.slane %v1892_v1, %v2209_v12  ;;  %v991_v5 = vrot.slane %v1892_v1, %v2214_v14 }
 0x88f   :  { %843 = vadd.xlane.f32.xlu0 %v842_v31  ;;  %839 = vadd.xlane.f32.xlu1 %v838_v33 }
 0x893   :  { %851 = vadd.xlane.f32.xlu0 %v850_v38  ;;  %847 = vadd.xlane.f32.xlu1 %v846_v39 }
 0x897   :  { %859 = vadd.xlane.f32.xlu0 %v858_v42  ;;  %855 = vadd.xlane.f32.xlu1 %v854_v44 }
 0x8a8   :  { %750 = vrot.lane.b32.xlu1 %v2368_v11, %s2133_s16 }
 0x8ad   :  { %753 = vrot.lane.b32.xlu0 %v2368_v11, %s2134_s17 }
 0x918   :  { %v832_v45 = vpop.xlane.xlu1 %831  ;;  %v836_v47 = vpop.xlane.xlu0 %835 }
 0x919   :  { %v861_v53 = vsel %vm398_vm5, %v832_v45, %v836_v47 }
 0x91c   :  { %v840_v49 = vpop.xlane.xlu1 %839  ;;  %v844_v51 = vpop.xlane.xlu0 %843 }
 0x91d   :  { %v862_v55 = vsel %vm400_vm6, %v861_v53, %v840_v49 }
 0x91e   :  { %v863_v60 = vsel %vm402_vm7, %v862_v55, %v844_v51 }
 0x920   :  { %v848_v50 = vpop.xlane.xlu1 %847  ;;  %v852_v57 = vpop.xlane.xlu0 %851 }
 0x921   :  { %v864_v11 = vsel %vm404_vm8, %v863_v60, %v848_v50 }
 0x922   :  { %v865_v61 = vsel %vm406_vm9, %v864_v11, %v852_v57 }
 0x924   :  { %v856_v52 = vpop.xlane.xlu1 %855  ;;  %v860_v63 = vpop.xlane.xlu0 %859 }
 0x925   :  { %v866_v18 = vsel %vm408_vm10, %v865_v61, %v856_v52 }
 0x926   :  { %v867_v0 = vsel %vm410_vm11, %v866_v18, %v860_v63 }
 0x928   :  { %v751_v58 = vpop.permute.xlu1 %750  ;;  %v754_v27 = vpop.permute.xlu0 %753 }
 0x929   :  { %1959 = vmatpush3.msra.mxu1 %v751_v58 }
 0x92a   :  { %1961 = vmatmul.mubr.msk.f32.vlgmr.msra.gmra.mrb[4].mxu1 %vm270_vm4, %v749_v16  ;;  %1963 = vmatprep.subr.mxu1 %v2121_v3  ;;  %v2014_v16 = vpack.c.bf16 %v1891_v15, %v1889_v13 }
 0x92b   :  { %1964 = vmatpush3.msra.mxu1 %v522_v59  ;;  %1965 = vmatprep.mubr.msk.f32.mxu1 %vm2124_vm1, %v2121_v3 }
 0x92c   :  { %1968 = vmatprep.subr.mxu1 %v2121_v3  ;;  %2015 = vmatprep.subr.bf16.mxu0 %v2014_v16 }
 0x92d   :  { %2017 = vmatpush1.bf16.msra.mxu0 %v2016_v20 }
 0x92e   :  { %1973 = vmatprep.subr.mxu0 %v2121_v3 }
 0x932   :  { %1966 = vmatmul.mubr.msk.f32.vlgmr.msra.gmra.mrb[4].mxu1 %vm270_vm4, %v867_v0 }
 0x933   :  { %1970 = vmatprep.mubr.msk.f32.mxu1 %vm2124_vm1, %v2121_v3 }
 0xa05   :  { %v937_v28 = vpop.f32.mrb[4].mxu1 }
 0xa06   :  { %v2027_v29 = vadd.f32 %v937_v28, %v754_v27  ;;  %v1967_v31 = vpop.f32.mrb[5].mxu1 }
 0xa08   :  { %v943_v33 = vmul.f32 0.70710677, %v2027_v29  ;;  %v942_v61 = vmul.f32 0.5, %v2027_v29 }
 0xa0a   :  { %v944_v35 = vand.u32 2147483647, %v943_v33  ;;  %v958_v39 = vmul.f32 %v943_v33, %v943_v33  ;;  %vm964_vm13 = vcmp.ge.f32.partialorder %v943_v33, 0.0 }
 0xa0c   :  { %v945_v36 = vmul.f32 0.3275911, %v944_v35  ;;  %v959_v41 = vsub.f32 0.0, %v958_v39 }
 0xa0e   :  { %v946_v38 = vadd.f32 1.0, %v945_v36  ;;  %v960_v45 = vmul.f32 1.442695, %v959_v41 }
 0xa10   :  { %2096 = vrcp.f32 %v946_v38 }
 0xa11   :  { %2098 = vpow2.f32 %v960_v45 }
 0xa1a   :  { %v2097_v40 = vpop.eup %2096 }
 0xa1b   :  { %v949_v42 = vmul.f32 1.0614054, %v2097_v40  ;;  %v2099_v57 = vpop.eup %2098 }
 0xa1d   :  { %v950_v44 = vadd.f32 -1.4531521, %v949_v42 }
 0xa1f   :  { %v951_v47 = vmul.f32 %v2097_v40, %v950_v44 }
 0xa21   :  { %v952_v49 = vadd.f32 1.4214138, %v951_v47 }
 0xa23   :  { %v953_v50 = vmul.f32 %v2097_v40, %v952_v49 }
 0xa25   :  { %v954_v51 = vadd.f32 -0.28449672, %v953_v50 }
 0xa27   :  { %v955_v52 = vmul.f32 %v2097_v40, %v954_v51 }
 0xa29   :  { %v956_v53 = vadd.f32 0.2548296, %v955_v52 }
 0xa2b   :  { %v957_v55 = vmul.f32 %v2097_v40, %v956_v53 }
 0xa2d   :  { %v962_v58 = vmul.f32 %v2099_v57, %v957_v55 }
 0xa2f   :  { %v963_v59 = vsub.f32 1.0, %v962_v58 }
 0xa31   :  { %v965_v60 = vsub.f32 0.0, %v963_v59 }
 0xa33   :  { %v966_v11 = vsel %vm964_vm13, %v963_v59, %v965_v60 }
 0xa34   :  { %v967_v63 = vadd.f32 1.0, %v966_v11 }
 0xa36   :  { %v968_v18 = vmul.f32 %v967_v63, %v942_v61 }
 0xa38   :  { %v2460_v0 = vadd.f32 %v968_v18, %v2357_v4 }
 0xa3a   :  { %1894 = vmatmul.mubr.msk.f32.vlgmr.msra.gmra.mrb[6].mxu0 %vm194_vm2, %v2460_v0 }
 0xa3b   :  { %1975 = vmatprep.mubr.msk.f32.mxu0 %vm2124_vm1, %v2121_v3 }
 0xb0d   :  { %v1063_v6 = vpop.f32.mrb[6].mxu0 }
 0xb0e   :  { %v2471_v7 = vadd.f32 %v1063_v6, %v987_v2  ;;  %v1065_v10 = vpop.f32.mrb[7].mxu0 }
 0xb0f   :  { %v1066_v4 = vadd.f32 %v1065_v10, %v991_v5 }
 0xb10   :  { %1117 = vrot.lane.b32.xlu1 %v2471_v7, %s2125_s19 }
 0xb11   :  { %1075 = vperm.xlu0 %2069, %v1066_v4  }
 0xb14   :  { %1070 = vperm.xlu1 %2068, %v1066_v4  }
 0xb15   :  { %2072 = vset.pattern.permute.xlu0 %v2127_v22 }
 0xb16   :  { %1093 = vperm.xlu0 %2072, %v1066_v4  }
 0xb18   :  { %2070 = vset.pattern.permute.xlu1 %v2126_v21 }
 0xb19   :  { %1081 = vperm.xlu1 %2070, %v1066_v4  }
 0xb1a   :  { %2075 = vset.pattern.permute.xlu0 %v2129_v24 }
 0xb1b   :  { %1111 = vperm.xlu0 %2075, %v1066_v4  }
 0xb1d   :  { %2071 = vset.pattern.permute.xlu1 %v2128_v23 }
 0xb1e   :  { %1087 = vperm.xlu1 %2071, %v1066_v4  }
 0xb1f   :  { %2077 = vset.pattern.permute.xlu0 %v2122_v8 }
 0xb22   :  { %2073 = vset.pattern.permute.xlu1 %v2130_v25 }
 0xb23   :  { %1099 = vperm.xlu1 %2073, %v1066_v4  }
 0xb27   :  { %2074 = vset.pattern.permute.xlu1 %v2131_v26 }
 0xb28   :  { %1105 = vperm.xlu1 %2074, %v1066_v4  }
 0xb2c   :  { %2076 = vset.pattern.permute.xlu1 %v2123_v9 }
 0xb82   :  { %v1118_v13 = vpop.permute.xlu1 %1117 }
 0xb83   :  { %1969 = vmatpush3.xpose.msk.msra.mxu1 %vm194_vm2, %v1118_v13 }
 0xb86   :  { %1971 = vmatmul.mubr.msk.f32.vlgmr.msra.gmra.mrb[6].mxu1 %vm194_vm2, %v2471_v7 }
 0xb87   :  { %1521 = vmatprep.mubr.f32.mxu1 %v2121_v3 }
 0xb90   :  { %v1076_v17 = vpop.permute.xlu0 %1075 }
 0xb91   :  { %v1078_v20 = vmul.f32 %v2242_v32, %v1076_v17 }
 0xb93   :  { %v1071_v15 = vpop.permute.xlu1 %1070 }
 0xb94   :  { %v1073_v19 = vmul.f32 %v1071_v15, %v2237_v30 }
 0xb95   :  { %v1094_v33 = vpop.permute.xlu0 %1093 }
 0xb96   :  { %v1079_v28 = vadd.f32 %v1078_v20, %v1073_v19  ;;  %v1096_v36 = vmul.f32 %v2261_v43, %v1094_v33 }
 0xb98   :  { %v1082_v16 = vpop.permute.xlu1 %1081 }
 0xb99   :  { %v1084_v27 = vmul.f32 %v2248_v34, %v1082_v16 }
 0xb9a   :  { %v1112_v44 = vpop.permute.xlu0 %1111 }
 0xb9b   :  { %v1085_v31 = vadd.f32 %v1084_v27, %v1079_v28  ;;  %v1114_v47 = vmul.f32 %v2279_v54, %v1112_v44 }
 0xb9d   :  { %v1088_v8 = vpop.permute.xlu1 %1087 }
 0xb9e   :  { %v1090_v9 = vmul.f32 %v2254_v37, %v1088_v8 }
 0xba0   :  { %v1091_v35 = vadd.f32 %v1090_v9, %v1085_v31 }
 0xba2   :  { %v1100_v29 = vpop.permute.xlu1 %1099  ;;  %v1097_v39 = vadd.f32 %v1096_v36, %v1091_v35 }
 0xba3   :  { %v1102_v40 = vmul.f32 %v2266_v46, %v1100_v29 }
 0xba5   :  { %v1103_v42 = vadd.f32 %v1102_v40, %v1097_v39  ;;  %v1893_v39 = vld [vmem:[%s2653_s8 + $0x8] sm:$0xff] }
 0xba7   :  { %v1106_v38 = vpop.permute.xlu1 %1105 }
 0xba8   :  { %v1108_v41 = vmul.f32 %v2272_v48, %v1106_v38 }
 0xbaa   :  { %v1109_v45 = vadd.f32 %v1108_v41, %v1103_v42 }
 0xbac   :  { %v1115_v49 = vadd.f32 %v1114_v47, %v1109_v45  ;;  %v1900_v47 = vld [vmem:[%s2651_s6 + $0x88] sm:$0xff] }
 0xc59   :  { %v1189_v50 = vpop.f32.mrb[6].mxu1 }
 0xc5a   :  { %v1190_v51 = vadd.f32 %v1189_v50, %v1115_v49  ;;  %v1972_v52 = vpop.f32.mrb[7].mxu1  ;;  %v1902_v49 = vld [vmem:[%s2651_s6 + $0x98] sm:$0xff] }
 0xc5b   :  { %v2018_v50 = vpack.c.bf16 %v1902_v49, %v1900_v47  ;;  %v1901_v52 = vld [vmem:[%s2651_s6 + $0x90] sm:$0xff] }
 0xc5c   :  { %v1193_v53 = vadd.f32 %v1190_v51, %v2288_v62  ;;  %v1899_v51 = vld [vmem:[%s2651_s6 + $0x80] sm:$0xff] }
 0xc5d   :  { %2019 = vmatprep.subr.bf16.mxu1 %v2018_v50 }
 0xc5e   :  { %v1194_v55 = vsel %vm270_vm4, %v1193_v53, -inf }
 0xc5f   :  { %1195 = vmax.xlane.f32.xlu1 %v1194_v55  ;;  %v1904_v55 = vld [vmem:[%s2651_s6 + $0xa8] sm:$0xff] }
 0xcec   :  { %v1196_v57 = vpop.xlane.xlu1 %1195 }
 0xced   :  { %v1197_v58 = vsub.f32 %v1193_v53, %v1196_v57  ;;  %v2020_v53 = vpack.c.bf16 %v1901_v52, %v1899_v51  ;;  %v1906_v57 = vld [vmem:[%s2651_s6 + $0xb8] sm:$0xff] }
 0xcef   :  { %v1198_v59 = vmul.f32 1.442695, %v1197_v58  ;;  %2021 = vmatpush1.bf16.msra.mxu1 %v2020_v53  ;;  %v2022_v58 = vpack.c.bf16 %v1906_v57, %v1904_v55  ;;  %v2116_v53 = vld [vmem:[%s2648_s1 + $0x20] sm:$0xff] }
 0xcf1   :  { %2100 = vpow2.f32 %v1198_v59  ;;  %v1903_v59 = vld [vmem:[%s2651_s6 + $0xa0] sm:$0xff]  ;;  %2023 = vmatprep.subr.bf16.mxu1 %v2022_v58 }
 0xcfb   :  { %v2101_v60 = vpop.eup %2100 }
 0xcfc   :  { %v1200_v11 = vmul.f32 %v2101_v60, %v2284_v56  ;;  %v1905_v60 = vld [vmem:[%s2651_s6 + $0xb0] sm:$0xff] }
 0xcfe   :  { %v1201_v61 = vsel %vm270_vm4, %v1200_v11, 0.0 }
 0xcff   :  { %1202 = vadd.xlane.f32.xlu0 %v1201_v61 }
 0xd8c   :  { %v1203_v63 = vpop.xlane.xlu0 %1202 }
 0xd8d   :  { %v1204_v18 = vmax.f32 %v1203_v63, 1e-20 }
 0xd8f   :  { %2102 = vrcp.f32 %v1204_v18 }
 0xd99   :  { %v2103_v1 = vpop.eup %2102 }
 0xd9a   :  { %v1206_v2 = vmul.f32 %v2103_v1, %v1204_v18 }
 0xd9c   :  { %v1207_v5 = vsub.f32 2.0, %v1206_v2 }
 0xd9e   :  { %v1208_v6 = vmul.f32 %v2103_v1, %v1207_v5 }
 0xda0   :  { %v1209_v10 = vmul.f32 %v1208_v6, %v1200_v11  ;;  %v2024_v11 = vpack.c.bf16 %v1905_v60, %v1903_v59  ;;  %v2117_v59 = vld [vmem:[%s2648_s1 + $0x28] sm:$0xff] }
 0xda2   :  { %v1293_v4 = vmul.f32 %v2242_v32, %v1209_v10  ;;  %v1289_v13 = vmul.f32 %v1209_v10, %v2237_v30  ;;  %v1301_v56 = vmul.f32 %v2254_v37, %v1209_v10  ;;  %v1297_v17 = vmul.f32 %v2248_v34, %v1209_v10  ;;  %2025 = vmatpush1.bf16.msra.mxu1 %v2024_v11  ;;  %v2118_v11 = vld [vmem:[%s2648_s1 + $0x30] sm:$0xff] }
 0xda3   :  { %v1309_v20 = vmul.f32 %v2266_v46, %v1209_v10  ;;  %v1305_v32 = vmul.f32 %v2261_v43, %v1209_v10  ;;  %v1317_v37 = vmul.f32 %v2279_v54, %v1209_v10  ;;  %v1313_v34 = vmul.f32 %v2272_v48, %v1209_v10  ;;  %1988 = vmatprep.subr.mxu1 %v2121_v3 }
 0xda4   :  { %v1294_v15 = vsel %vm270_vm4, %v1293_v4, 0.0  ;;  %v1290_v16 = vsel %vm270_vm4, %v1289_v13, 0.0  ;;  %v1302_v8 = vsel %vm270_vm4, %v1301_v56, 0.0  ;;  %v1298_v19 = vsel %vm270_vm4, %v1297_v17, 0.0 }
 0xda5   :  { %1295 = vadd.xlane.f32.xlu0 %v1294_v15  ;;  %1291 = vadd.xlane.f32.xlu1 %v1290_v16  ;;  %v1310_v30 = vsel %vm270_vm4, %v1309_v20, 0.0  ;;  %v1306_v27 = vsel %vm270_vm4, %v1305_v32, 0.0  ;;  %v1318_v28 = vsel %vm270_vm4, %v1317_v37, 0.0  ;;  %v1314_v9 = vsel %vm270_vm4, %v1313_v34, 0.0 }
 0xda9   :  { %1303 = vadd.xlane.f32.xlu0 %v1302_v8  ;;  %1299 = vadd.xlane.f32.xlu1 %v1298_v19 }
 0xdad   :  { %1311 = vadd.xlane.f32.xlu0 %v1310_v30  ;;  %1307 = vadd.xlane.f32.xlu1 %v1306_v27 }
 0xdb1   :  { %1319 = vadd.xlane.f32.xlu0 %v1318_v28  ;;  %1315 = vadd.xlane.f32.xlu1 %v1314_v9 }
 0xdc2   :  { %1210 = vrot.lane.b32.xlu1 %v2471_v7, %s2133_s16 }
 0xdc7   :  { %1213 = vrot.lane.b32.xlu0 %v2471_v7, %s2134_s17 }
 0xe32   :  { %v1292_v43 = vpop.xlane.xlu1 %1291  ;;  %v1296_v46 = vpop.xlane.xlu0 %1295 }
 0xe33   :  { %v1321_v33 = vsel %vm398_vm5, %v1292_v43, %v1296_v46 }
 0xe36   :  { %v1300_v29 = vpop.xlane.xlu1 %1299  ;;  %v1304_v31 = vpop.xlane.xlu0 %1303 }
 0xe37   :  { %v1322_v35 = vsel %vm400_vm6, %v1321_v33, %v1300_v29  ;;  %v1907_v33 = vld [vmem:[%s2652_s7 + $0x4] sm:$0x3] }
 0xe38   :  { %v1323_v40 = vsel %vm402_vm7, %v1322_v35, %v1304_v31  ;;  %v1447_v35 = vrot.slane %v1907_v33, %v2209_v12 }
 0xe3a   :  { %v1308_v54 = vpop.xlane.xlu1 %1307  ;;  %v1312_v36 = vpop.xlane.xlu0 %1311 }
 0xe3b   :  { %v1324_v7 = vsel %vm404_vm8, %v1323_v40, %v1308_v54 }
 0xe3c   :  { %v1325_v41 = vsel %vm406_vm9, %v1324_v7, %v1312_v36  ;;  %v1451_v36 = vrot.slane %v1907_v33, %v2214_v14 }
 0xe3e   :  { %v1316_v48 = vpop.xlane.xlu1 %1315  ;;  %v1320_v42 = vpop.xlane.xlu0 %1319 }
 0xe3f   :  { %v1326_v44 = vsel %vm408_vm10, %v1325_v41, %v1316_v48  ;;  %v2114_v41 = vld [vmem:[%s2648_s1 + $0x10] sm:$0xff] }
 0xe40   :  { %v1327_v45 = vsel %vm410_vm11, %v1326_v44, %v1320_v42 }
 0xe42   :  { %v1211_v38 = vpop.permute.xlu1 %1210  ;;  %v1214_v61 = vpop.permute.xlu0 %1213 }
 0xe43   :  { %1974 = vmatpush3.msra.mxu0 %v1211_v38 }
 0xe44   :  { %1976 = vmatmul.mubr.msk.f32.vlgmr.msra.gmra.mrb[8].mxu0 %vm270_vm4, %v1209_v10  ;;  %1978 = vmatprep.subr.mxu0 %v2121_v3 }
 0xe45   :  { %1979 = vmatpush3.msra.mxu0 %v1893_v39  ;;  %1980 = vmatprep.mubr.msk.f32.mxu0 %vm2124_vm1, %v2121_v3 }
 0xe46   :  { %1983 = vmatprep.subr.mxu0 %v2121_v3 }
 0xe4c   :  { %1981 = vmatmul.mubr.msk.f32.vlgmr.msra.gmra.mrb[8].mxu0 %vm270_vm4, %v1327_v45  ;;  %v2115_v45 = vld [vmem:[%s2648_s1 + $0x18] sm:$0xff] }
 0xe4d   :  { %1985 = vmatprep.mubr.msk.f32.mxu0 %vm2124_vm1, %v2121_v3 }
 0xf1f   :  { %v1397_v63 = vpop.f32.mrb[8].mxu0 }
 0xf20   :  { %v2028_v18 = vadd.f32 %v1397_v63, %v1214_v61  ;;  %v1982_v1 = vpop.f32.mrb[9].mxu0 }
 0xf22   :  { %v1403_v2 = vmul.f32 0.70710677, %v2028_v18  ;;  %v1402_v29 = vmul.f32 0.5, %v2028_v18 }
 0xf24   :  { %v1404_v5 = vand.u32 2147483647, %v1403_v2  ;;  %v1418_v4 = vmul.f32 %v1403_v2, %v1403_v2  ;;  %vm1424_vm14 = vcmp.ge.f32.partialorder %v1403_v2, 0.0  ;;  %v2119_v2 = vld [vmem:[%s2648_s1 + $0x38] sm:$0xff] }
 0xf26   :  { %v1405_v6 = vmul.f32 0.3275911, %v1404_v5  ;;  %v1419_v15 = vsub.f32 0.0, %v1418_v4 }
 0xf28   :  { %v1406_v10 = vadd.f32 1.0, %v1405_v6  ;;  %v1420_v17 = vmul.f32 1.442695, %v1419_v15 }
 0xf2a   :  { %2104 = vrcp.f32 %v1406_v10 }
 0xf2b   :  { %2106 = vpow2.f32 %v1420_v17 }
 0xf34   :  { %v2105_v13 = vpop.eup %2104 }
 0xf35   :  { %v1409_v16 = vmul.f32 1.0614054, %v2105_v13  ;;  %v2107_v34 = vpop.eup %2106 }
 0xf37   :  { %v1410_v56 = vadd.f32 -1.4531521, %v1409_v16 }
 0xf39   :  { %v1411_v8 = vmul.f32 %v2105_v13, %v1410_v56 }
 0xf3b   :  { %v1412_v19 = vadd.f32 1.4214138, %v1411_v8 }
 0xf3d   :  { %v1413_v20 = vmul.f32 %v2105_v13, %v1412_v19 }
 0xf3f   :  { %v1414_v32 = vadd.f32 -0.28449672, %v1413_v20  ;;  %v2120_v20 = vld [vmem:[%s2649_s2] sm:$0xff] }
 0xf41   :  { %v1415_v30 = vmul.f32 %v2105_v13, %v1414_v32 }
 0xf43   :  { %v1416_v27 = vadd.f32 0.2548296, %v1415_v30 }
 0xf45   :  { %v1417_v37 = vmul.f32 %v2105_v13, %v1416_v27 }
 0xf47   :  { %v1422_v28 = vmul.f32 %v2107_v34, %v1417_v37 }
 0xf49   :  { %v1423_v9 = vsub.f32 1.0, %v1422_v28 }
 0xf4b   :  { %v1425_v43 = vsub.f32 0.0, %v1423_v9 }
 0xf4d   :  { %v1426_v46 = vsel %vm1424_vm14, %v1423_v9, %v1425_v43 }
 0xf4e   :  { %v1427_v54 = vadd.f32 1.0, %v1426_v46 }
 0xf50   :  { %v1428_v31 = vmul.f32 %v1427_v54, %v1402_v29 }
 0xf52   :  { %v1429_v48 = vadd.f32 %v1428_v31, %v2460_v0 }
 0xf54   :  { %1909 = vmatmul.mubr.msk.f32.vlgmr.msra.gmra.mrb[8].mxu1 %vm194_vm2, %v1429_v48 }
 0xf55   :  { %1990 = vmatprep.mubr.msk.f32.mxu1 %vm2124_vm1, %v2121_v3 }
0x1027   :  { %v1523_v38 = vpop.f32.mrb[8].mxu1 }
0x1028   :  { %v2571_v39 = vadd.f32 %v1523_v38, %v1447_v35  ;;  %v1525_v40 = vpop.f32.mrb[9].mxu1 }
0x1029   :  { %v1526_v7 = vadd.f32 %v1525_v40, %v1451_v36 }
0x102a   :  { %1577 = vrot.lane.b32.xlu1 %v2571_v39, %s2125_s19 }
0x102b   :  { %1535 = vperm.xlu0 %2077, %v1526_v7  }
0x102e   :  { %1530 = vperm.xlu1 %2076, %v1526_v7  }
0x102f   :  { %2080 = vset.pattern.permute.xlu0 %v2127_v22 }
0x1030   :  { %1553 = vperm.xlu0 %2080, %v1526_v7  }
0x1032   :  { %2078 = vset.pattern.permute.xlu1 %v2126_v21 }
0x1033   :  { %1541 = vperm.xlu1 %2078, %v1526_v7  }
0x1034   :  { %2083 = vset.pattern.permute.xlu0 %v2129_v24 }
0x1035   :  { %1571 = vperm.xlu0 %2083, %v1526_v7  }
0x1037   :  { %2079 = vset.pattern.permute.xlu1 %v2128_v23  ;;  %v2112_v23 = vld [vmem:[%s2648_s1] sm:$0xff] }
0x1038   :  { %1547 = vperm.xlu1 %2079, %v1526_v7  }
0x103c   :  { %2081 = vset.pattern.permute.xlu1 %v2130_v25  ;;  %v2113_v25 = vld [vmem:[%s2648_s1 + $0x8] sm:$0xff] }
0x103d   :  { %1559 = vperm.xlu1 %2081, %v1526_v7  }
0x1041   :  { %2082 = vset.pattern.permute.xlu1 %v2131_v26 }
0x1042   :  { %1565 = vperm.xlu1 %2082, %v1526_v7  }
0x109c   :  { %v1578_v12 = vpop.permute.xlu1 %1577 }
0x109d   :  { %1984 = vmatpush3.xpose.msk.msra.mxu0 %vm194_vm2, %v1578_v12 }
0x10a0   :  { %1986 = vmatmul.mubr.msk.f32.vlgmr.msra.gmra.mrb[10].mxu0 %vm194_vm2, %v2571_v39 }
0x10aa   :  { %v1536_v22 = vpop.permute.xlu0 %1535 }
0x10ab   :  { %v1538_v26 = vmul.f32 %v2113_v25, %v1536_v22 }
0x10ad   :  { %v1531_v14 = vpop.permute.xlu1 %1530 }
0x10ae   :  { %v1533_v0 = vmul.f32 %v2112_v23, %v1531_v14 }
0x10af   :  { %v1554_v51 = vpop.permute.xlu0 %1553 }
0x10b0   :  { %v1539_v44 = vadd.f32 %v1538_v26, %v1533_v0  ;;  %v1556_v55 = vmul.f32 %v2116_v53, %v1554_v51 }
0x10b2   :  { %v1542_v21 = vpop.permute.xlu1 %1541 }
0x10b3   :  { %v1544_v42 = vmul.f32 %v2114_v41, %v1542_v21 }
0x10b4   :  { %v1572_v18 = vpop.permute.xlu0 %1571 }
0x10b5   :  { %v1545_v50 = vadd.f32 %v1544_v42, %v1539_v44  ;;  %v1574_v5 = vmul.f32 %v2119_v2, %v1572_v18 }
0x10b7   :  { %v1548_v24 = vpop.permute.xlu1 %1547 }
0x10b8   :  { %v1550_v47 = vmul.f32 %v2115_v45, %v1548_v24 }
0x10ba   :  { %v1551_v52 = vadd.f32 %v1550_v47, %v1545_v50  ;;  %v1908_v50 = vld [vmem:[%s2653_s8 + $0x10] sm:$0xff] }
0x10bc   :  { %v1560_v49 = vpop.permute.xlu1 %1559  ;;  %v1557_v58 = vadd.f32 %v1556_v55, %v1551_v52 }
0x10bd   :  { %v1562_v60 = vmul.f32 %v2117_v59, %v1560_v49 }
0x10bf   :  { %v1563_v63 = vadd.f32 %v1562_v60, %v1557_v58 }
0x10c1   :  { %v1566_v57 = vpop.permute.xlu1 %1565 }
0x10c2   :  { %v1568_v61 = vmul.f32 %v2118_v11, %v1566_v57 }
0x10c4   :  { %v1569_v1 = vadd.f32 %v1568_v61, %v1563_v63 }
0x10c6   :  { %v1575_v6 = vadd.f32 %v1574_v5, %v1569_v1 }
0x1173   :  { %v1649_v10 = vpop.f32.mrb[10].mxu0 }
0x1174   :  { %v1650_v4 = vadd.f32 %v1649_v10, %v1575_v6  ;;  %v1987_v13 = vpop.f32.mrb[11].mxu0 }
0x1176   :  { %v1653_v15 = vadd.f32 %v1650_v4, %v2288_v62 }
0x1178   :  { %v1654_v16 = vsel %vm270_vm4, %v1653_v15, -inf }
0x1179   :  { %1655 = vmax.xlane.f32.xlu1 %v1654_v16 }
0x1206   :  { %v1656_v56 = vpop.xlane.xlu1 %1655 }
0x1207   :  { %v1657_v17 = vsub.f32 %v1653_v15, %v1656_v56 }
0x1209   :  { %v1658_v8 = vmul.f32 1.442695, %v1657_v17 }
0x120b   :  { %2108 = vpow2.f32 %v1658_v8 }
0x1215   :  { %v2109_v19 = vpop.eup %2108 }
0x1216   :  { %v1660_v32 = vmul.f32 %v2120_v20, %v2109_v19 }
0x1218   :  { %v1661_v30 = vsel %vm270_vm4, %v1660_v32, 0.0 }
0x1219   :  { %1662 = vadd.xlane.f32.xlu0 %v1661_v30 }
0x12a6   :  { %v1663_v27 = vpop.xlane.xlu0 %1662 }
0x12a7   :  { %v1664_v37 = vmax.f32 %v1663_v27, 1e-20 }
0x12a9   :  { %2110 = vrcp.f32 %v1664_v37 }
0x12b3   :  { %v2111_v62 = vpop.eup %2110 }
0x12b4   :  { %v1666_v34 = vmul.f32 %v2111_v62, %v1664_v37 }
0x12b6   :  { %v1667_v28 = vsub.f32 2.0, %v1666_v34 }
0x12b8   :  { %v1668_v9 = vmul.f32 %v2111_v62, %v1667_v28 }
0x12ba   :  { %v1669_v43 = vmul.f32 %v1668_v9, %v1660_v32 }
0x12bc   :  { %v1753_v46 = vmul.f32 %v2113_v25, %v1669_v43  ;;  %v1749_v29 = vmul.f32 %v2112_v23, %v1669_v43  ;;  %v1761_v48 = vmul.f32 %v2115_v45, %v1669_v43  ;;  %v1757_v33 = vmul.f32 %v2114_v41, %v1669_v43 }
0x12bd   :  { %v1769_v38 = vmul.f32 %v2117_v59, %v1669_v43  ;;  %v1765_v40 = vmul.f32 %v2116_v53, %v1669_v43  ;;  %v1777_v14 = vmul.f32 %v2119_v2, %v1669_v43  ;;  %v1773_v21 = vmul.f32 %v2118_v11, %v1669_v43 }
0x12be   :  { %v1754_v54 = vsel %vm270_vm4, %v1753_v46, 0.0  ;;  %v1750_v31 = vsel %vm270_vm4, %v1749_v29, 0.0  ;;  %v1762_v35 = vsel %vm270_vm4, %v1761_v48, 0.0  ;;  %v1758_v36 = vsel %vm270_vm4, %v1757_v33, 0.0 }
0x12bf   :  { %1755 = vadd.xlane.f32.xlu0 %v1754_v54  ;;  %1751 = vadd.xlane.f32.xlu1 %v1750_v31  ;;  %v1770_v7 = vsel %vm270_vm4, %v1769_v38, 0.0  ;;  %v1766_v12 = vsel %vm270_vm4, %v1765_v40, 0.0  ;;  %v1778_v22 = vsel %vm270_vm4, %v1777_v14, 0.0  ;;  %v1774_v24 = vsel %vm270_vm4, %v1773_v21, 0.0 }
0x12c3   :  { %1763 = vadd.xlane.f32.xlu0 %v1762_v35  ;;  %1759 = vadd.xlane.f32.xlu1 %v1758_v36 }
0x12c7   :  { %1771 = vadd.xlane.f32.xlu0 %v1770_v7  ;;  %1767 = vadd.xlane.f32.xlu1 %v1766_v12 }
0x12cb   :  { %1779 = vadd.xlane.f32.xlu0 %v1778_v22  ;;  %1775 = vadd.xlane.f32.xlu1 %v1774_v24 }
0x12dc   :  { %1670 = vrot.lane.b32.xlu1 %v2571_v39, %s2133_s16 }
0x12e1   :  { %1673 = vrot.lane.b32.xlu0 %v2571_v39, %s2134_s17 }
0x134c   :  { %v1752_v23 = vpop.xlane.xlu1 %1751  ;;  %v1756_v0 = vpop.xlane.xlu0 %1755 }
0x134d   :  { %v1781_v44 = vsel %vm398_vm5, %v1752_v23, %v1756_v0 }
0x1350   :  { %v1760_v25 = vpop.xlane.xlu1 %1759  ;;  %v1764_v41 = vpop.xlane.xlu0 %1763 }
0x1351   :  { %v1782_v45 = vsel %vm400_vm6, %v1781_v44, %v1760_v25 }
0x1352   :  { %v1783_v51 = vsel %vm402_vm7, %v1782_v45, %v1764_v41 }
0x1354   :  { %v1768_v26 = vpop.xlane.xlu1 %1767  ;;  %v1772_v47 = vpop.xlane.xlu0 %1771 }
0x1355   :  { %v1784_v39 = vsel %vm404_vm8, %v1783_v51, %v1768_v26 }
0x1356   :  { %v1785_v52 = vsel %vm406_vm9, %v1784_v39, %v1772_v47 }
0x1358   :  { %v1776_v42 = vpop.xlane.xlu1 %1775  ;;  %v1780_v53 = vpop.xlane.xlu0 %1779 }
0x1359   :  { %v1786_v55 = vsel %vm408_vm10, %v1785_v52, %v1776_v42 }
0x135a   :  { %v1787_v57 = vsel %vm410_vm11, %v1786_v55, %v1780_v53 }
0x135c   :  { %v1671_v49 = vpop.permute.xlu1 %1670  ;;  %v1674_v58 = vpop.permute.xlu0 %1673 }
0x135d   :  { %1989 = vmatpush3.msra.mxu1 %v1671_v49 }
0x135e   :  { %1991 = vmatmul.mubr.msk.f32.vlgmr.msra.gmra.mrb[10].mxu1 %vm270_vm4, %v1669_v43  ;;  %1993 = vmatprep.subr.mxu1 %v2121_v3 }
0x135f   :  { %1994 = vmatpush3.msra.mxu1 %v1908_v50  ;;  %1995 = vmatprep.mubr.msk.f32.mxu1 %vm2124_vm1, %v2121_v3 }
0x1366   :  { %1996 = vmatmul.mubr.msk.f32.vlgmr.msra.gmra.mrb[10].mxu1 %vm270_vm4, %v1787_v57 }
0x1439   :  { %v1857_v59 = vpop.f32.mrb[10].mxu1 }
0x143a   :  { %v2029_v60 = vadd.f32 %v1857_v59, %v1674_v58  ;;  %v1997_v11 = vpop.f32.mrb[11].mxu1 }
0x143c   :  { %1862 = vst.msk [vmem:[%s2654_s9] sm:$0xff] %vm194_vm2, %v2029_v60 }

</bundles_post_ra>
